<compile_context>
chip_gen: v7x
topology: tpu7x:2x2x1
jax: 0.10.0
libtpu: 0.0.40
codegen_flags: <defaults>
</compile_context>

<pallas_src>
import functools

import jax
import jax.numpy as jnp
from jax.experimental import pallas as pl
from jax.experimental.pallas import tpu as pltpu


_BN_EPS = 1e-5
_TM_MAX = 256          # tile M only when M is large; otherwise one full-M block


def _round_up(x, m):
    return (x + m - 1) // m * m


# ----------------------------------------------------------------------------
# Pallas kernel: (A @ B) * scale + bias, optional LeakyReLU epilogue
# ----------------------------------------------------------------------------
def _mm_bn_act_kernel(a_ref, b_ref, sb_ref, o_ref, *, negative_slope):
    acc = jnp.dot(a_ref[...], b_ref[...], preferred_element_type=jnp.float32)
    out = acc * sb_ref[0:1, :] + sb_ref[1:2, :]          # fused BN affine (f32)
    if negative_slope is not None:
        out = jnp.where(out >= 0.0, out, negative_slope * out)
    o_ref[...] = out.astype(o_ref.dtype)


def pallas_mm_bn_act(a_bf16, b_bf16, sb_f32, negative_slope):
    """leaky_relu((a @ b) * sb[0] + sb[1]).  K and N are kept at real size."""
    M, K = a_bf16.shape
    _, N = b_bf16.shape

    if M <= _TM_MAX:
        tm, Mp = M, M                       # single block == full array dims
    else:
        tm = _TM_MAX
        Mp = _round_up(M, tm)
        a_bf16 = jnp.pad(a_bf16, ((0, Mp - M), (0, 0)))

    out = pl.pallas_call(
        functools.partial(_mm_bn_act_kernel, negative_slope=negative_slope),
        out_shape=jax.ShapeDtypeStruct((Mp, N), jnp.float32),
        grid=(Mp // tm,),
        in_specs=[
            pl.BlockSpec((tm, K), lambda i: (i, 0)),   # patches tile (full K)
            pl.BlockSpec((K, N), lambda i: (0, 0)),    # weights, resident
            pl.BlockSpec((2, N), lambda i: (0, 0)),    # scale/bias, resident
        ],
        out_specs=pl.BlockSpec((tm, N), lambda i: (i, 0)),
        compiler_params=pltpu.CompilerParams(
            dimension_semantics=("parallel",)),
    )(a_bf16, b_bf16, sb_f32)
    return out[:M] if Mp != M else out


# ----------------------------------------------------------------------------
# Glue: im2col (fused into the surrounding jit) and conv stage wrapper
# ----------------------------------------------------------------------------
def _im2col(x_nhwc, kh, kw, stride, pad):
    n, h, w, c = x_nhwc.shape
    xp = jnp.pad(x_nhwc, ((0, 0), (pad, pad), (pad, pad), (0, 0)))
    ho = (h + 2 * pad - kh) // stride + 1
    wo = (w + 2 * pad - kw) // stride + 1
    cols = []
    for i in range(kh):
        for j in range(kw):
            cols.append(xp[:, i:i + stride * ho:stride,
                           j:j + stride * wo:stride, :])
    patches = jnp.concatenate(cols, axis=-1)             # (n, ho, wo, kh*kw*c)
    return patches.reshape(n * ho * wo, kh * kw * c), (n, ho, wo)


def _conv_block(x_nhwc, layer, stride, negative_slope):
    patches, (n, ho, wo) = _im2col(x_nhwc, 3, 3, stride, 1)
    out = pallas_mm_bn_act(patches.astype(jnp.bfloat16), layer["w"],
                           layer["sb"], negative_slope)
    return out.reshape(n, ho, wo, -1)


# ----------------------------------------------------------------------------
# Parameters (synthetic, deterministic) and one-time folding/prep
# ----------------------------------------------------------------------------
def _make_conv(key, cin, cout, k=3):
    kw, kb = jax.random.split(key)
    fan = k * k * cin
    w = jax.random.normal(kw, (k, k, cin, cout), jnp.float32) * (2.0 / fan) ** 0.5
    b = 0.01 * jax.random.normal(kb, (cout,), jnp.float32)
    return w, b


def _make_bn(key, c):
    k1, k2, k3, k4 = jax.random.split(key, 4)
    gamma = 1.0 + 0.1 * jax.random.normal(k1, (c,), jnp.float32)
    beta = 0.1 * jax.random.normal(k2, (c,), jnp.float32)
    mean = 0.1 * jax.random.normal(k3, (c,), jnp.float32)
    var = 1.0 + 0.1 * jnp.abs(jax.random.normal(k4, (c,), jnp.float32))
    return gamma, beta, mean, var


def _fold(w, conv_b, bn):
    """Fold conv bias + inference BatchNorm into (scale, bias); prep operands."""
    k, _, cin, cout = w.shape
    if bn is None:
        scale = jnp.ones((cout,), jnp.float32)
        bias = conv_b
    else:
        gamma, beta, mean, var = bn
        scale = gamma / jnp.sqrt(var + _BN_EPS)
        bias = scale * (conv_b - mean) + beta
    return {
        "w": w.reshape(k * k * cin, cout).astype(jnp.bfloat16),   # (K, N) bf16
        "sb": jnp.stack([scale, bias], axis=0),                   # (2, N) f32
    }


def make_fcdiscriminator_params(key, ndf=64):
    # conv1_1 / bn1_1 of the PyTorch module are never used in forward(); omitted.
    # TODO(synk): training-mode BatchNorm (batch statistics) not implemented;
    #             inference-mode folded running stats are used instead.
    keys = jax.random.split(key, 9)
    return {
        "conv1_2": _fold(*_make_conv(keys[0], 4, ndf), _make_bn(keys[1], ndf)),
        "conv2": _fold(*_make_conv(keys[2], ndf, ndf), _make_bn(keys[3], ndf)),
        "conv3": _fold(*_make_conv(keys[4], ndf, ndf), _make_bn(keys[5], ndf)),
        "conv4": _fold(*_make_conv(keys[6], ndf, ndf), _make_bn(keys[7], ndf)),
        "classifier": _fold(*_make_conv(keys[8], ndf, 1), None),
    }


# ----------------------------------------------------------------------------
# FCDiscriminator_SOD.forward
# ----------------------------------------------------------------------------
def fcdiscriminator_sod_forward(params, x, pred):
    """x: (N,3,H,W), pred: (N,1,H,W)  ->  (N,1,H/8,W/8). NCHW in/out."""
    xc = jnp.concatenate([x, pred], axis=1)              # torch.cat((x, pred), 1)
    h = jnp.transpose(xc, (0, 2, 3, 1))                  # NHWC internally
    h = _conv_block(h, params["conv1_2"], stride=2, negative_slope=0.2)
    h = _conv_block(h, params["conv2"], stride=1, negative_slope=0.2)
    h = _conv_block(h, params["conv3"], stride=2, negative_slope=0.2)
    h = _conv_block(h, params["conv4"], stride=1, negative_slope=0.2)
    h = _conv_block(h, params["classifier"], stride=2, negative_slope=None)
    return jnp.transpose(h, (0, 3, 1, 2))


if __name__ == "__main__":
    key = jax.random.PRNGKey(0)
    k_params, k_x, k_pred = jax.random.split(key, 3)

    N, H, W, NDF = 2, 16, 16, 64
    x = jax.random.normal(k_x, (N, 3, H, W), jnp.float32)
    pred = jax.random.normal(k_pred, (N, 1, H, W), jnp.float32)

    params = make_fcdiscriminator_params(k_params, ndf=NDF)

    fwd = jax.jit(fcdiscriminator_sod_forward)
    out = fwd(params, x, pred)
    jax.block_until_ready(out)

    assert out.shape == (N, 1, H // 8, W // 8), out.shape
    assert bool(jnp.all(jnp.isfinite(out)))
    print("KERNEL_OK")
</pallas_src>

<mosaic_0001>
module attributes {stable_mosaic.version = 11 : i64} {
  func.func @_mm_bn_act_kernel(%arg0: i32, %arg1: memref<128x36xbf16, #tpu.memory_space<vmem>>, %arg2: memref<36x64xbf16, #tpu.memory_space<vmem>>, %arg3: memref<2x64xf32, #tpu.memory_space<vmem>>, %arg4: memref<128x64xf32, #tpu.memory_space<vmem>>) attributes {dimension_semantics = [#tpu.dimension_semantics<parallel>], iteration_bounds = array<i64: 1>, scalar_prefetch = 0 : i64, scratch_operands = 0 : i64, tpu.core_type = #tpu.core_type<tc>, window_params = [{transform_indices = @transform_0, window_bounds = array<i64: 128, 36>}, {pipeline_mode = #tpu.pipeline_mode<synchronous>, transform_indices = @transform_1, window_bounds = array<i64: 36, 64>}, {pipeline_mode = #tpu.pipeline_mode<synchronous>, transform_indices = @transform_2, window_bounds = array<i64: 2, 64>}, {transform_indices = @transform_3, window_bounds = array<i64: 128, 64>}]} {
    %c0 = arith.constant 0 : index
    %c0_0 = arith.constant 0 : index
    %0 = vector.load %arg1[%c0, %c0_0] : memref<128x36xbf16, #tpu.memory_space<vmem>>, vector<128x36xbf16>
    %c0_1 = arith.constant 0 : index
    %c0_2 = arith.constant 0 : index
    %1 = vector.load %arg2[%c0_1, %c0_2] : memref<36x64xbf16, #tpu.memory_space<vmem>>, vector<36x64xbf16>
    %cst = arith.constant dense<0.000000e+00> : vector<128x64xf32>
    %2 = tpu.matmul %0, %1, %cst {dimension_numbers = #tpu.dot_dimension_numbers<[1], [0], [0], [1], [0, 0, 1, 1], [], []>} : vector<128x36xbf16>, vector<36x64xbf16>, vector<128x64xf32> -> vector<128x64xf32>
    %c0_3 = arith.constant 0 : index
    %c0_4 = arith.constant 0 : index
    %3 = vector.load %arg3[%c0_3, %c0_4] : memref<2x64xf32, #tpu.memory_space<vmem>>, vector<1x64xf32>
    %4 = vector.broadcast %3 : vector<1x64xf32> to vector<128x64xf32>
    %5 = arith.mulf %2, %4 : vector<128x64xf32>
    %c1 = arith.constant 1 : index
    %c0_5 = arith.constant 0 : index
    %6 = vector.load %arg3[%c1, %c0_5] : memref<2x64xf32, #tpu.memory_space<vmem>>, vector<1x64xf32>
    %7 = vector.broadcast %6 : vector<1x64xf32> to vector<128x64xf32>
    %8 = arith.addf %5, %7 : vector<128x64xf32>
    %cst_6 = arith.constant 0.000000e+00 : f32
    %9 = vector.broadcast %cst_6 : f32 to vector<128x64xf32>
    %10 = arith.cmpf oge, %8, %9 : vector<128x64xf32>
    %cst_7 = arith.constant 2.000000e-01 : f32
    %11 = vector.broadcast %cst_7 : f32 to vector<128x64xf32>
    %12 = arith.mulf %11, %8 : vector<128x64xf32>
    %13 = arith.select %10, %8, %12 : vector<128x64xi1>, vector<128x64xf32>
    %c0_8 = arith.constant 0 : index
    %c0_9 = arith.constant 0 : index
    %14 = vector.load %arg4[%c0_8, %c0_9] : memref<128x64xf32, #tpu.memory_space<vmem>>, vector<128x64xf32>
    tpu.vector_store %arg4[%c0_8, %c0_9], %13 {strides = array<i32>} : memref<128x64xf32, #tpu.memory_space<vmem>>, vector<128x64xf32>,
    return
  }
  func.func @transform_0(%arg0: i32) -> (i32, i32) {
    %c0_i32 = arith.constant 0 : i32
    %c0_i32_0 = arith.constant 0 : i32
    return %arg0, %c0_i32 : i32, i32
  }
  func.func @transform_1(%arg0: i32) -> (i32, i32) {
    %c0_i32 = arith.constant 0 : i32
    %c0_i32_0 = arith.constant 0 : i32
    %c0_i32_1 = arith.constant 0 : i32
    return %c0_i32, %c0_i32_0 : i32, i32
  }
  func.func @transform_2(%arg0: i32) -> (i32, i32) {
    %c0_i32 = arith.constant 0 : i32
    %c0_i32_0 = arith.constant 0 : i32
    %c0_i32_1 = arith.constant 0 : i32
    return %c0_i32, %c0_i32_0 : i32, i32
  }
  func.func @transform_3(%arg0: i32) -> (i32, i32) {
    %c0_i32 = arith.constant 0 : i32
    %c0_i32_0 = arith.constant 0 : i32
    return %arg0, %c0_i32 : i32, i32
  }
}

module attributes {stable_mosaic.version = 11 : i64} {
  func.func @_mm_bn_act_kernel(%arg0: i32, %arg1: memref<128x576xbf16, #tpu.memory_space<vmem>>, %arg2: memref<576x64xbf16, #tpu.memory_space<vmem>>, %arg3: memref<2x64xf32, #tpu.memory_space<vmem>>, %arg4: memref<128x64xf32, #tpu.memory_space<vmem>>) attributes {dimension_semantics = [#tpu.dimension_semantics<parallel>], iteration_bounds = array<i64: 1>, scalar_prefetch = 0 : i64, scratch_operands = 0 : i64, tpu.core_type = #tpu.core_type<tc>, window_params = [{transform_indices = @transform_0, window_bounds = array<i64: 128, 576>}, {pipeline_mode = #tpu.pipeline_mode<synchronous>, transform_indices = @transform_1, window_bounds = array<i64: 576, 64>}, {pipeline_mode = #tpu.pipeline_mode<synchronous>, transform_indices = @transform_2, window_bounds = array<i64: 2, 64>}, {transform_indices = @transform_3, window_bounds = array<i64: 128, 64>}]} {
    %c0 = arith.constant 0 : index
    %c0_0 = arith.constant 0 : index
    %0 = vector.load %arg1[%c0, %c0_0] : memref<128x576xbf16, #tpu.memory_space<vmem>>, vector<128x576xbf16>
    %c0_1 = arith.constant 0 : index
    %c0_2 = arith.constant 0 : index
    %1 = vector.load %arg2[%c0_1, %c0_2] : memref<576x64xbf16, #tpu.memory_space<vmem>>, vector<576x64xbf16>
    %cst = arith.constant dense<0.000000e+00> : vector<128x64xf32>
    %2 = tpu.matmul %0, %1, %cst {dimension_numbers = #tpu.dot_dimension_numbers<[1], [0], [0], [1], [0, 0, 1, 1], [], []>} : vector<128x576xbf16>, vector<576x64xbf16>, vector<128x64xf32> -> vector<128x64xf32>
    %c0_3 = arith.constant 0 : index
    %c0_4 = arith.constant 0 : index
    %3 = vector.load %arg3[%c0_3, %c0_4] : memref<2x64xf32, #tpu.memory_space<vmem>>, vector<1x64xf32>
    %4 = vector.broadcast %3 : vector<1x64xf32> to vector<128x64xf32>
    %5 = arith.mulf %2, %4 : vector<128x64xf32>
    %c1 = arith.constant 1 : index
    %c0_5 = arith.constant 0 : index
    %6 = vector.load %arg3[%c1, %c0_5] : memref<2x64xf32, #tpu.memory_space<vmem>>, vector<1x64xf32>
    %7 = vector.broadcast %6 : vector<1x64xf32> to vector<128x64xf32>
    %8 = arith.addf %5, %7 : vector<128x64xf32>
    %cst_6 = arith.constant 0.000000e+00 : f32
    %9 = vector.broadcast %cst_6 : f32 to vector<128x64xf32>
    %10 = arith.cmpf oge, %8, %9 : vector<128x64xf32>
    %cst_7 = arith.constant 2.000000e-01 : f32
    %11 = vector.broadcast %cst_7 : f32 to vector<128x64xf32>
    %12 = arith.mulf %11, %8 : vector<128x64xf32>
    %13 = arith.select %10, %8, %12 : vector<128x64xi1>, vector<128x64xf32>
    %c0_8 = arith.constant 0 : index
    %c0_9 = arith.constant 0 : index
    %14 = vector.load %arg4[%c0_8, %c0_9] : memref<128x64xf32, #tpu.memory_space<vmem>>, vector<128x64xf32>
    tpu.vector_store %arg4[%c0_8, %c0_9], %13 {strides = array<i32>} : memref<128x64xf32, #tpu.memory_space<vmem>>, vector<128x64xf32>,
    return
  }
  func.func @transform_0(%arg0: i32) -> (i32, i32) {
    %c0_i32 = arith.constant 0 : i32
    %c0_i32_0 = arith.constant 0 : i32
    return %arg0, %c0_i32 : i32, i32
  }
  func.func @transform_1(%arg0: i32) -> (i32, i32) {
    %c0_i32 = arith.constant 0 : i32
    %c0_i32_0 = arith.constant 0 : i32
    %c0_i32_1 = arith.constant 0 : i32
    return %c0_i32, %c0_i32_0 : i32, i32
  }
  func.func @transform_2(%arg0: i32) -> (i32, i32) {
    %c0_i32 = arith.constant 0 : i32
    %c0_i32_0 = arith.constant 0 : i32
    %c0_i32_1 = arith.constant 0 : i32
    return %c0_i32, %c0_i32_0 : i32, i32
  }
  func.func @transform_3(%arg0: i32) -> (i32, i32) {
    %c0_i32 = arith.constant 0 : i32
    %c0_i32_0 = arith.constant 0 : i32
    return %arg0, %c0_i32 : i32, i32
  }
}

module attributes {stable_mosaic.version = 11 : i64} {
  func.func @_mm_bn_act_kernel(%arg0: i32, %arg1: memref<32x576xbf16, #tpu.memory_space<vmem>>, %arg2: memref<576x64xbf16, #tpu.memory_space<vmem>>, %arg3: memref<2x64xf32, #tpu.memory_space<vmem>>, %arg4: memref<32x64xf32, #tpu.memory_space<vmem>>) attributes {dimension_semantics = [#tpu.dimension_semantics<parallel>], iteration_bounds = array<i64: 1>, scalar_prefetch = 0 : i64, scratch_operands = 0 : i64, tpu.core_type = #tpu.core_type<tc>, window_params = [{transform_indices = @transform_0, window_bounds = array<i64: 32, 576>}, {pipeline_mode = #tpu.pipeline_mode<synchronous>, transform_indices = @transform_1, window_bounds = array<i64: 576, 64>}, {pipeline_mode = #tpu.pipeline_mode<synchronous>, transform_indices = @transform_2, window_bounds = array<i64: 2, 64>}, {transform_indices = @transform_3, window_bounds = array<i64: 32, 64>}]} {
    %c0 = arith.constant 0 : index
    %c0_0 = arith.constant 0 : index
    %0 = vector.load %arg1[%c0, %c0_0] : memref<32x576xbf16, #tpu.memory_space<vmem>>, vector<32x576xbf16>
    %c0_1 = arith.constant 0 : index
    %c0_2 = arith.constant 0 : index
    %1 = vector.load %arg2[%c0_1, %c0_2] : memref<576x64xbf16, #tpu.memory_space<vmem>>, vector<576x64xbf16>
    %cst = arith.constant dense<0.000000e+00> : vector<32x64xf32>
    %2 = tpu.matmul %0, %1, %cst {dimension_numbers = #tpu.dot_dimension_numbers<[1], [0], [0], [1], [0, 0, 1, 1], [], []>} : vector<32x576xbf16>, vector<576x64xbf16>, vector<32x64xf32> -> vector<32x64xf32>
    %c0_3 = arith.constant 0 : index
    %c0_4 = arith.constant 0 : index
    %3 = vector.load %arg3[%c0_3, %c0_4] : memref<2x64xf32, #tpu.memory_space<vmem>>, vector<1x64xf32>
    %4 = vector.broadcast %3 : vector<1x64xf32> to vector<32x64xf32>
    %5 = arith.mulf %2, %4 : vector<32x64xf32>
    %c1 = arith.constant 1 : index
    %c0_5 = arith.constant 0 : index
    %6 = vector.load %arg3[%c1, %c0_5] : memref<2x64xf32, #tpu.memory_space<vmem>>, vector<1x64xf32>
    %7 = vector.broadcast %6 : vector<1x64xf32> to vector<32x64xf32>
    %8 = arith.addf %5, %7 : vector<32x64xf32>
    %cst_6 = arith.constant 0.000000e+00 : f32
    %9 = vector.broadcast %cst_6 : f32 to vector<32x64xf32>
    %10 = arith.cmpf oge, %8, %9 : vector<32x64xf32>
    %cst_7 = arith.constant 2.000000e-01 : f32
    %11 = vector.broadcast %cst_7 : f32 to vector<32x64xf32>
    %12 = arith.mulf %11, %8 : vector<32x64xf32>
    %13 = arith.select %10, %8, %12 : vector<32x64xi1>, vector<32x64xf32>
    %c0_8 = arith.constant 0 : index
    %c0_9 = arith.constant 0 : index
    %14 = vector.load %arg4[%c0_8, %c0_9] : memref<32x64xf32, #tpu.memory_space<vmem>>, vector<32x64xf32>
    tpu.vector_store %arg4[%c0_8, %c0_9], %13 {strides = array<i32>} : memref<32x64xf32, #tpu.memory_space<vmem>>, vector<32x64xf32>,
    return
  }
  func.func @transform_0(%arg0: i32) -> (i32, i32) {
    %c0_i32 = arith.constant 0 : i32
    %c0_i32_0 = arith.constant 0 : i32
    return %arg0, %c0_i32 : i32, i32
  }
  func.func @transform_1(%arg0: i32) -> (i32, i32) {
    %c0_i32 = arith.constant 0 : i32
    %c0_i32_0 = arith.constant 0 : i32
    %c0_i32_1 = arith.constant 0 : i32
    return %c0_i32, %c0_i32_0 : i32, i32
  }
  func.func @transform_2(%arg0: i32) -> (i32, i32) {
    %c0_i32 = arith.constant 0 : i32
    %c0_i32_0 = arith.constant 0 : i32
    %c0_i32_1 = arith.constant 0 : i32
    return %c0_i32, %c0_i32_0 : i32, i32
  }
  func.func @transform_3(%arg0: i32) -> (i32, i32) {
    %c0_i32 = arith.constant 0 : i32
    %c0_i32_0 = arith.constant 0 : i32
    return %arg0, %c0_i32 : i32, i32
  }
}

module attributes {stable_mosaic.version = 11 : i64} {
  func.func @_mm_bn_act_kernel(%arg0: i32, %arg1: memref<8x576xbf16, #tpu.memory_space<vmem>>, %arg2: memref<576x1xbf16, #tpu.memory_space<vmem>>, %arg3: memref<2x1xf32, #tpu.memory_space<vmem>>, %arg4: memref<8x1xf32, #tpu.memory_space<vmem>>) attributes {dimension_semantics = [#tpu.dimension_semantics<parallel>], iteration_bounds = array<i64: 1>, scalar_prefetch = 0 : i64, scratch_operands = 0 : i64, tpu.core_type = #tpu.core_type<tc>, window_params = [{transform_indices = @transform_0, window_bounds = array<i64: 8, 576>}, {pipeline_mode = #tpu.pipeline_mode<synchronous>, transform_indices = @transform_1, window_bounds = array<i64: 576, 1>}, {pipeline_mode = #tpu.pipeline_mode<synchronous>, transform_indices = @transform_2, window_bounds = array<i64: 2, 1>}, {transform_indices = @transform_3, window_bounds = array<i64: 8, 1>}]} {
    %c0 = arith.constant 0 : index
    %c0_0 = arith.constant 0 : index
    %0 = vector.load %arg1[%c0, %c0_0] : memref<8x576xbf16, #tpu.memory_space<vmem>>, vector<8x576xbf16>
    %c0_1 = arith.constant 0 : index
    %c0_2 = arith.constant 0 : index
    %1 = vector.load %arg2[%c0_1, %c0_2] : memref<576x1xbf16, #tpu.memory_space<vmem>>, vector<576x1xbf16>
    %cst = arith.constant dense<0.000000e+00> : vector<8x1xf32>
    %2 = tpu.matmul %0, %1, %cst {dimension_numbers = #tpu.dot_dimension_numbers<[1], [0], [0], [1], [0, 0, 1, 1], [], []>} : vector<8x576xbf16>, vector<576x1xbf16>, vector<8x1xf32> -> vector<8x1xf32>
    %c0_3 = arith.constant 0 : index
    %c0_4 = arith.constant 0 : index
    %3 = vector.load %arg3[%c0_3, %c0_4] : memref<2x1xf32, #tpu.memory_space<vmem>>, vector<1x1xf32>
    %4 = vector.broadcast %3 : vector<1x1xf32> to vector<8x1xf32>
    %5 = arith.mulf %2, %4 : vector<8x1xf32>
    %c1 = arith.constant 1 : index
    %c0_5 = arith.constant 0 : index
    %6 = vector.load %arg3[%c1, %c0_5] : memref<2x1xf32, #tpu.memory_space<vmem>>, vector<1x1xf32>
    %7 = vector.broadcast %6 : vector<1x1xf32> to vector<8x1xf32>
    %8 = arith.addf %5, %7 : vector<8x1xf32>
    %c0_6 = arith.constant 0 : index
    %c0_7 = arith.constant 0 : index
    %9 = vector.load %arg4[%c0_6, %c0_7] : memref<8x1xf32, #tpu.memory_space<vmem>>, vector<8x1xf32>
    tpu.vector_store %arg4[%c0_6, %c0_7], %8 {strides = array<i32>} : memref<8x1xf32, #tpu.memory_space<vmem>>, vector<8x1xf32>,
    return
  }
  func.func @transform_0(%arg0: i32) -> (i32, i32) {
    %c0_i32 = arith.constant 0 : i32
    %c0_i32_0 = arith.constant 0 : i32
    return %arg0, %c0_i32 : i32, i32
  }
  func.func @transform_1(%arg0: i32) -> (i32, i32) {
    %c0_i32 = arith.constant 0 : i32
    %c0_i32_0 = arith.constant 0 : i32
    %c0_i32_1 = arith.constant 0 : i32
    return %c0_i32, %c0_i32_0 : i32, i32
  }
  func.func @transform_2(%arg0: i32) -> (i32, i32) {
    %c0_i32 = arith.constant 0 : i32
    %c0_i32_0 = arith.constant 0 : i32
    %c0_i32_1 = arith.constant 0 : i32
    return %c0_i32, %c0_i32_0 : i32, i32
  }
  func.func @transform_3(%arg0: i32) -> (i32, i32) {
    %c0_i32 = arith.constant 0 : i32
    %c0_i32_0 = arith.constant 0 : i32
    return %arg0, %c0_i32 : i32, i32
  }
}

</mosaic_0001>

<bundles_post_ra>
// kernel: fcdiscriminator_sod_forward.5
= control target key start
LH: loop header
LB: loop body
LE: loop exit
PB: predicated region body
PF: predicated region fallthrough
CT: control target
= control target key end

     0   :  { %vm91_vm0 = vcmask 293888   ;;  %vm116_vm1 = vcmask 1041408   ;;  %vm307_vm2 = vcmask 523264   ;;  %s568_s1 = inlined_call_operand.vmem [shape: bf16[36,64], index: 1, kind: input, shape index: {}]   ;;  %s569_s0 = inlined_call_operand.vmem [shape: bf16[128,36], index: 0, kind: input, shape index: {}]   ;;  %s570_s2 = inlined_call_operand.vmem [shape: f32[2,64], index: 2, kind: input, shape index: {}]   ;;  %s571_s3 = inlined_call_operand.vmem [shape: f32[128,64], index: 3, kind: output, shape index: {}]  }
   0x1   :  { %v390_v0 = vld [vmem:[%s568_s1] sm:$0xff]   ;;  %v391_v1 = vld [vmem:[%s568_s1 + $0x8] sm:$0xff]   ;;  %v392_v2 = vld [vmem:[%s568_s1 + $0x10] ss:$0 sps:$4 sm:$0x33]  }
   0x2   :  { %360 = vmatprep.subr.bf16.mxu0 %v390_v0  ;;  %382 = vmatprep.subr.bf16.mxu1 %v390_v0  ;;  %v393_v3 = vld [vmem:[%s569_s0] sm:$0xff]   ;;  %v118_v5 = vsel %vm116_vm1, %v392_v2, 0  ;;  %v395_v6 = vld [vmem:[%s569_s0 + $0x8] sm:$0xff]   ;;  %v397_v8 = vld [vmem:[%s569_s0 + $0x10] sm:$0xff]  }
   0x3   :  { %361 = vmatpush3.bf16.msra.mxu0 %v390_v0  ;;  %385 = vmatpush3.bf16.msra.mxu1 %v390_v0  ;;  %v394_v4 = vld [vmem:[%s569_s0 + $0x20] sm:$0xff]   ;;  %v396_v7 = vld [vmem:[%s569_s0 + $0x28] sm:$0xff]   ;;  %v398_v9 = vld [vmem:[%s569_s0 + $0x30] sm:$0xff]  }
   0x4   :  { %362 = vmatprep.subr.bf16.mxu0 %v391_v1  ;;  %383 = vmatprep.subr.bf16.mxu1 %v391_v1  ;;  %v399_v10 = vld [vmem:[%s569_s0 + $0x18] sm:$0xff]   ;;  %v465_v12 = vld [vmem:[%s570_s2] ss:$0 sm:$0xff]  ;;  %v470_v14 = vld [vmem:[%s570_s2 + $0x1] ss:$0 sm:$0xff] }
   0x5   :  { %366 = vmatprep.mubr.msk.bf16.mxu0 %vm91_vm0, %v393_v3  ;;  %374 = vmatprep.mubr.msk.bf16.mxu1 %vm91_vm0, %v394_v4  ;;  %v400_v11 = vld [vmem:[%s569_s0 + $0x38] sm:$0xff]  }
   0x7   :  { %363 = vmatpush3.bf16.msra.mxu0 %v391_v1  ;;  %386 = vmatpush3.bf16.msra.mxu1 %v391_v1 }
   0x8   :  { %388 = vmatprep.subr.msk.bf16.mxu0 %vm116_vm1, %v392_v2  ;;  %389 = vmatprep.subr.msk.bf16.mxu1 %vm116_vm1, %v392_v2 }
   0xb   :  { %365 = vmatpush3.bf16.msra.mxu0 %v118_v5  ;;  %387 = vmatpush3.bf16.msra.mxu1 %v118_v5 }
   0xe   :  { %367 = vmatmul.mubr.msk.bf16.vlgmr.msra.gmra.mrb[0].mxu0 %vm91_vm0, %v395_v6  ;;  %375 = vmatmul.mubr.msk.bf16.vlgmr.msra.gmra.mrb[0].mxu1 %vm91_vm0, %v396_v7 }
   0xf   :  { %370 = vmatprep.mubr.msk.bf16.mxu0 %vm91_vm0, %v397_v8  ;;  %378 = vmatprep.mubr.msk.bf16.mxu1 %vm91_vm0, %v398_v9 }
  0x16   :  { %371 = vmatmul.mubr.msk.bf16.gmra.mrb[4].mxu0 %vm91_vm0, %v399_v10  ;;  %379 = vmatmul.mubr.msk.bf16.gmra.mrb[4].mxu1 %vm91_vm0, %v400_v11 }
  0xe1   :  { %v368_v13 = vpop.f32.mrb[0].mxu0  ;;  %v376_v15 = vpop.f32.mrb[0].mxu1 }
  0xe2   :  { %v224_v16 = vmul.f32 %v368_v13, %v465_v12  ;;  %v232_v17 = vmul.f32 %v376_v15, %v465_v12  ;;  %v154_v18 = vpop.f32.mrb[1].mxu0  ;;  %v186_v19 = vpop.f32.mrb[1].mxu1 }
  0xe3   :  { %v222_v20 = vmul.f32 %v465_v12, %v154_v18  ;;  %v230_v21 = vmul.f32 %v465_v12, %v186_v19  ;;  %v369_v22 = vpop.f32.mrb[2].mxu0  ;;  %v377_v23 = vpop.f32.mrb[2].mxu1 }
  0xe4   :  { %v245_v24 = vadd.f32 %v470_v14, %v224_v16  ;;  %v253_v25 = vadd.f32 %v470_v14, %v232_v17  ;;  %v225_v26 = vmul.f32 %v369_v22, %v465_v12  ;;  %v233_v27 = vmul.f32 %v377_v23, %v465_v12  ;;  %v157_v28 = vpop.f32.mrb[3].mxu0  ;;  %v189_v29 = vpop.f32.mrb[3].mxu1 }
  0xe5   :  { %v243_v30 = vadd.f32 %v470_v14, %v222_v20  ;;  %v251_v31 = vadd.f32 %v470_v14, %v230_v21  ;;  %v223_v32 = vmul.f32 %v465_v12, %v157_v28  ;;  %v231_v33 = vmul.f32 %v465_v12, %v189_v29 }
  0xe6   :  { %vm261_vm3 = vcmp.ge.f32.partialorder %v245_v24, 0.0  ;;  %v277_v34 = vmul.f32 0.2, %v245_v24  ;;  %vm269_vm4 = vcmp.ge.f32.partialorder %v253_v25, 0.0  ;;  %v285_v35 = vmul.f32 0.2, %v253_v25 }
  0xe7   :  { %vm259_vm5 = vcmp.ge.f32.partialorder %v243_v30, 0.0  ;;  %v275_v36 = vmul.f32 0.2, %v243_v30  ;;  %vm267_vm6 = vcmp.ge.f32.partialorder %v251_v31, 0.0  ;;  %v283_v37 = vmul.f32 0.2, %v251_v31 }
  0xe8   :  { %v293_v38 = vsel %vm261_vm3, %v245_v24, %v277_v34  ;;  %v301_v39 = vsel %vm269_vm4, %v253_v25, %v285_v35  ;;  %v246_v40 = vadd.f32 %v470_v14, %v225_v26  ;;  %v254_v41 = vadd.f32 %v470_v14, %v233_v27 }
  0xe9   :  { %310 = vst.msk [vmem:[%s571_s3 + $0x10] sm:$0xff] %vm307_vm2, %v293_v38  ;;  %318 = vst.msk [vmem:[%s571_s3 + $0x50] sm:$0xff] %vm307_vm2, %v301_v39  ;;  %v291_v42 = vsel %vm259_vm5, %v243_v30, %v275_v36  ;;  %v299_v43 = vsel %vm267_vm6, %v251_v31, %v283_v37  ;;  %v244_v44 = vadd.f32 %v470_v14, %v223_v32  ;;  %v372_v46 = vpop.f32.mrb[4].mxu0  ;;  %v380_v47 = vpop.f32.mrb[4].mxu1 }
  0xea   :  { %v252_v45 = vadd.f32 %v470_v14, %v231_v33  ;;  %308 = vst.msk [vmem:[%s571_s3] sm:$0xff] %vm307_vm2, %v291_v42  ;;  %316 = vst.msk [vmem:[%s571_s3 + $0x40] sm:$0xff] %vm307_vm2, %v299_v43  ;;  %vm262_vm7 = vcmp.ge.f32.partialorder %v246_v40, 0.0  ;;  %v278_v48 = vmul.f32 0.2, %v246_v40  ;;  %vm270_vm8 = vcmp.ge.f32.partialorder %v254_v41, 0.0 }
  0xeb   :  { %v286_v49 = vmul.f32 0.2, %v254_v41  ;;  %vm260_vm9 = vcmp.ge.f32.partialorder %v244_v44, 0.0  ;;  %v276_v50 = vmul.f32 0.2, %v244_v44  ;;  %v228_v54 = vmul.f32 %v372_v46, %v465_v12  ;;  %v170_v56 = vpop.f32.mrb[5].mxu0 }
  0xec   :  { %vm268_vm10 = vcmp.ge.f32.partialorder %v252_v45, 0.0  ;;  %v284_v51 = vmul.f32 0.2, %v252_v45  ;;  %v294_v52 = vsel %vm262_vm7, %v246_v40, %v278_v48  ;;  %v236_v55 = vmul.f32 %v380_v47, %v465_v12  ;;  %v202_v57 = vpop.f32.mrb[5].mxu1  ;;  %v373_v62 = vpop.f32.mrb[6].mxu0 }
  0xed   :  { %v302_v53 = vsel %vm270_vm8, %v254_v41, %v286_v49  ;;  %311 = vst.msk [vmem:[%s571_s3 + $0x18] sm:$0xff] %vm307_vm2, %v294_v52  ;;  %v292_v58 = vsel %vm260_vm9, %v244_v44, %v276_v50  ;;  %v226_v60 = vmul.f32 %v465_v12, %v170_v56  ;;  %v234_v61 = vmul.f32 %v465_v12, %v202_v57  ;;  %v381_v63 = vpop.f32.mrb[6].mxu1  ;;  %v173_v4 = vpop.f32.mrb[7].mxu0 }
  0xee   :  { %319 = vst.msk [vmem:[%s571_s3 + $0x58] sm:$0xff] %vm307_vm2, %v302_v53  ;;  %v300_v59 = vsel %vm268_vm10, %v252_v45, %v284_v51  ;;  %309 = vst.msk [vmem:[%s571_s3 + $0x8] sm:$0xff] %vm307_vm2, %v292_v58  ;;  %v249_v0 = vadd.f32 %v470_v14, %v228_v54  ;;  %v257_v1 = vadd.f32 %v470_v14, %v236_v55  ;;  %v205_v5 = vpop.f32.mrb[7].mxu1 }
  0xef   :  { %317 = vst.msk [vmem:[%s571_s3 + $0x48] sm:$0xff] %vm307_vm2, %v300_v59  ;;  %v229_v2 = vmul.f32 %v373_v62, %v465_v12  ;;  %v237_v3 = vmul.f32 %v381_v63, %v465_v12  ;;  %v247_v6 = vadd.f32 %v470_v14, %v226_v60  ;;  %v255_v7 = vadd.f32 %v470_v14, %v234_v61 }
  0xf0   :  { %v227_v8 = vmul.f32 %v465_v12, %v173_v4  ;;  %v235_v9 = vmul.f32 %v465_v12, %v205_v5  ;;  %vm265_vm11 = vcmp.ge.f32.partialorder %v249_v0, 0.0  ;;  %v281_v10 = vmul.f32 0.2, %v249_v0 }
  0xf1   :  { %vm273_vm12 = vcmp.ge.f32.partialorder %v257_v1, 0.0  ;;  %v289_v11 = vmul.f32 0.2, %v257_v1  ;;  %vm263_vm13 = vcmp.ge.f32.partialorder %v247_v6, 0.0  ;;  %v279_v13 = vmul.f32 0.2, %v247_v6 }
  0xf2   :  { %vm271_vm14 = vcmp.ge.f32.partialorder %v255_v7, 0.0  ;;  %v287_v15 = vmul.f32 0.2, %v255_v7  ;;  %v297_v16 = vsel %vm265_vm11, %v249_v0, %v281_v10  ;;  %v250_v18 = vadd.f32 %v470_v14, %v229_v2 }
  0xf3   :  { %v305_v17 = vsel %vm273_vm12, %v257_v1, %v289_v11  ;;  %v258_v19 = vadd.f32 %v470_v14, %v237_v3  ;;  %314 = vst.msk [vmem:[%s571_s3 + $0x30] sm:$0xff] %vm307_vm2, %v297_v16  ;;  %v295_v12 = vsel %vm263_vm13, %v247_v6, %v279_v13  ;;  %v248_v21 = vadd.f32 %v470_v14, %v227_v8 }
  0xf4   :  { %322 = vst.msk [vmem:[%s571_s3 + $0x70] sm:$0xff] %vm307_vm2, %v305_v17  ;;  %v303_v20 = vsel %vm271_vm14, %v255_v7, %v287_v15  ;;  %v256_v22 = vadd.f32 %v470_v14, %v235_v9  ;;  %312 = vst.msk [vmem:[%s571_s3 + $0x20] sm:$0xff] %vm307_vm2, %v295_v12  ;;  %vm266_vm15 = vcmp.ge.f32.partialorder %v250_v18, 0.0  ;;  %v282_v23 = vmul.f32 0.2, %v250_v18 }
  0xf5   :  { %320 = vst.msk [vmem:[%s571_s3 + $0x60] sm:$0xff] %vm307_vm2, %v303_v20  ;;  %vm274_vm0 = vcmp.ge.f32.partialorder %v258_v19, 0.0  ;;  %v290_v24 = vmul.f32 0.2, %v258_v19  ;;  %vm264_vm1 = vcmp.ge.f32.partialorder %v248_v21, 0.0 }
  0xf6   :  { %v280_v25 = vmul.f32 0.2, %v248_v21  ;;  %vm272_vm3 = vcmp.ge.f32.partialorder %v256_v22, 0.0  ;;  %v288_v26 = vmul.f32 0.2, %v256_v22  ;;  %v298_v27 = vsel %vm266_vm15, %v250_v18, %v282_v23 }
  0xf7   :  { %v306_v14 = vsel %vm274_vm0, %v258_v19, %v290_v24  ;;  %315 = vst.msk [vmem:[%s571_s3 + $0x38] sm:$0xff] %vm307_vm2, %v298_v27 }
  0xf8   :  { %323 = vst.msk [vmem:[%s571_s3 + $0x78] sm:$0xff] %vm307_vm2, %v306_v14  ;;  %v296_v28 = vsel %vm264_vm1, %v248_v21, %v280_v25  ;;  %v304_v29 = vsel %vm272_vm3, %v256_v22, %v288_v26 }
  0xf9   :  { %313 = vst.msk [vmem:[%s571_s3 + $0x28] sm:$0xff] %vm307_vm2, %v296_v28  ;;  %321 = vst.msk [vmem:[%s571_s3 + $0x68] sm:$0xff] %vm307_vm2, %v304_v29 }

// kernel: fcdiscriminator_sod_forward.6
= control target key start
LH: loop header
LB: loop body
LE: loop exit
PB: predicated region body
PF: predicated region fallthrough
CT: control target
= control target key end

     0   :  { %vm551_vm0 = vcmask 523264   ;;  %s1729_s1 = inlined_call_operand.vmem [shape: bf16[576,64], index: 1, kind: input, shape index: {}]   ;;  %s1730_s0 = inlined_call_operand.vmem [shape: bf16[128,576], index: 0, kind: input, shape index: {}]   ;;  %s1731_s2 = inlined_call_operand.vmem [shape: f32[2,64], index: 2, kind: input, shape index: {}]   ;;  %s1732_s3 = inlined_call_operand.vmem [shape: f32[128,64], index: 3, kind: output, shape index: {}]  }
   0x1   :  { %v1235_v0 = vld [vmem:[%s1729_s1 + $0x40] sm:$0xff]   ;;  %v1239_v4 = vld [vmem:[%s1729_s1 + $0x48] sm:$0xff]   ;;  %v1243_v8 = vld [vmem:[%s1729_s1 + $0x50] sm:$0xff]  }
   0x2   :  { %v1236_v1 = vld [vmem:[%s1729_s1 + $0xc0] sm:$0xff]   ;;  %1063 = vmatprep.subr.bf16.mxu0 %v1235_v0  ;;  %v1240_v5 = vld [vmem:[%s1729_s1 + $0xc8] sm:$0xff]   ;;  %v1244_v9 = vld [vmem:[%s1729_s1 + $0xd0] sm:$0xff]  }
   0x3   :  { %v1237_v2 = vld [vmem:[%s1729_s1] sm:$0xff]   ;;  %1127 = vmatprep.subr.bf16.mxu1 %v1236_v1  ;;  %v1241_v6 = vld [vmem:[%s1729_s1 + $0x8] sm:$0xff]   ;;  %v1245_v10 = vld [vmem:[%s1729_s1 + $0x10] sm:$0xff]  }
   0x4   :  { %v1238_v3 = vld [vmem:[%s1729_s1 + $0x80] sm:$0xff]   ;;  %1064 = vmatpush3.bf16.msra.mxu0 %v1237_v2  ;;  %v1242_v7 = vld [vmem:[%s1729_s1 + $0x88] sm:$0xff]   ;;  %v1246_v11 = vld [vmem:[%s1729_s1 + $0x90] sm:$0xff]  }
   0x5   :  { %1128 = vmatpush3.bf16.msra.mxu1 %v1238_v3  ;;  %1065 = vmatprep.subr.bf16.mxu0 %v1239_v4  ;;  %v1247_v12 = vld [vmem:[%s1729_s1 + $0x58] sm:$0xff]   ;;  %v1251_v16 = vld [vmem:[%s1729_s1 + $0x60] sm:$0xff]   ;;  %v1255_v20 = vld [vmem:[%s1729_s1 + $0x68] sm:$0xff]  }
   0x6   :  { %1129 = vmatprep.subr.bf16.mxu1 %v1240_v5  ;;  %v1248_v13 = vld [vmem:[%s1729_s1 + $0xd8] sm:$0xff]   ;;  %v1252_v17 = vld [vmem:[%s1729_s1 + $0xe0] sm:$0xff]   ;;  %v1256_v21 = vld [vmem:[%s1729_s1 + $0xe8] sm:$0xff]  }
   0x7   :  { %v1249_v14 = vld [vmem:[%s1729_s1 + $0x18] sm:$0xff]   ;;  %v1253_v18 = vld [vmem:[%s1729_s1 + $0x20] sm:$0xff]   ;;  %v1257_v22 = vld [vmem:[%s1729_s1 + $0x28] sm:$0xff]  }
   0x8   :  { %1066 = vmatpush3.bf16.msra.mxu0 %v1241_v6  ;;  %v1250_v15 = vld [vmem:[%s1729_s1 + $0x98] sm:$0xff]   ;;  %v1254_v19 = vld [vmem:[%s1729_s1 + $0xa0] sm:$0xff]   ;;  %v1258_v23 = vld [vmem:[%s1729_s1 + $0xa8] sm:$0xff]  }
   0x9   :  { %1130 = vmatpush3.bf16.msra.mxu1 %v1242_v7  ;;  %1067 = vmatprep.subr.bf16.mxu0 %v1243_v8  ;;  %v1259_v24 = vld [vmem:[%s1729_s1 + $0x70] sm:$0xff]   ;;  %v1263_v28 = vld [vmem:[%s1729_s1 + $0x78] sm:$0xff]   ;;  %v1272_v35 = vld [vmem:[%s1730_s0 + $0xc] ss:$20 sps:$4 sm:$0xff]  }
   0xa   :  { %1131 = vmatprep.subr.bf16.mxu1 %v1244_v9  ;;  %v1260_v25 = vld [vmem:[%s1729_s1 + $0xf0] sm:$0xff]   ;;  %v1264_v29 = vld [vmem:[%s1729_s1 + $0xf8] sm:$0xff]   ;;  %v1273_v36 = vld [vmem:[%s1729_s1 + $0x100] sm:$0xff]   ;;  %705 = vmatprep.mubr.bf16.mxu1 %v1272_v35 }
   0xb   :  { %v1261_v26 = vld [vmem:[%s1729_s1 + $0x30] sm:$0xff]   ;;  %v1265_v30 = vld [vmem:[%s1729_s1 + $0x38] sm:$0xff]   ;;  %v1274_v37 = vld [vmem:[%s1730_s0 + $0x2c] ss:$20 sps:$4 sm:$0xff]  }
   0xc   :  { %1068 = vmatpush3.bf16.msra.mxu0 %v1245_v10  ;;  %v1262_v27 = vld [vmem:[%s1729_s1 + $0xb0] sm:$0xff]   ;;  %v1266_v31 = vld [vmem:[%s1729_s1 + $0xb8] sm:$0xff]   ;;  %v1286_v42 = vld [vmem:[%s1729_s1 + $0x108] sm:$0xff]  }
   0xd   :  { %1132 = vmatpush3.bf16.msra.mxu1 %v1246_v11  ;;  %1069 = vmatprep.subr.bf16.mxu0 %v1247_v12  ;;  %v1267_v32 = vld [vmem:[%s1730_s0] ss:$20 sps:$4 sm:$0xff]   ;;  %v1269_v33 = vld [vmem:[%s1730_s0 + $0x4] ss:$20 sps:$4 sm:$0xff]   ;;  %v1270_v34 = vld [vmem:[%s1730_s0 + $0x8] ss:$20 sps:$4 sm:$0xff]  }
   0xe   :  { %1133 = vmatprep.subr.bf16.mxu1 %v1248_v13  ;;  %608 = vmatprep.mubr.bf16.mxu0 %v1269_v33  ;;  %v1276_v38 = vld [vmem:[%s1730_s0 + $0x34] ss:$20 sps:$4 sm:$0xff]   ;;  %v1279_v40 = vld [vmem:[%s1730_s0 + $0x30] ss:$20 sps:$4 sm:$0xff]   ;;  %v1285_v45 = vld [vmem:[%s1730_s0 + $0x58] ss:$20 sps:$4 sm:$0xff]  }
   0xf   :  { %v1278_v39 = vld [vmem:[%s1730_s0 + $0x28] ss:$20 sps:$4 sm:$0xff]   ;;  %v1284_v44 = vld [vmem:[%s1730_s0 + $0x50] ss:$20 sps:$4 sm:$0xff]   ;;  %v1291_v50 = vld [vmem:[%s1730_s0 + $0x78] ss:$20 sps:$4 sm:$0xff]  }
  0x10   :  { %1070 = vmatpush3.bf16.msra.mxu0 %v1249_v14  ;;  %v1280_v41 = vld [vmem:[%s1730_s0 + $0x54] ss:$20 sps:$4 sm:$0xff]   ;;  %v1282_v43 = vld [vmem:[%s1730_s0 + $0x5c] ss:$20 sps:$4 sm:$0xff]   ;;  %v1289_v48 = vld [vmem:[%s1730_s0 + $0x84] ss:$20 sps:$4 sm:$0xff]  }
  0x11   :  { %1134 = vmatpush3.bf16.msra.mxu1 %v1250_v15  ;;  %1071 = vmatprep.subr.bf16.mxu0 %v1251_v16  ;;  %v1299_v46 = vld [vmem:[%s1729_s1 + $0x110] sm:$0xff]   ;;  %v1312_v49 = vld [vmem:[%s1729_s1 + $0x118] sm:$0xff]   ;;  %v1295_v53 = vld [vmem:[%s1730_s0 + $0xac] ss:$20 sps:$4 sm:$0xff]  }
  0x12   :  { %1135 = vmatprep.subr.bf16.mxu1 %v1252_v17  ;;  %v1287_v47 = vld [vmem:[%s1730_s0 + $0x7c] ss:$20 sps:$4 sm:$0xff]   ;;  %v1292_v51 = vld [vmem:[%s1730_s0 + $0x80] ss:$20 sps:$4 sm:$0xff]   ;;  %v1293_v52 = vld [vmem:[%s1730_s0 + $0xa4] ss:$20 sps:$4 sm:$0xff]  }
  0x13   :  { %v1297_v54 = vld [vmem:[%s1730_s0 + $0xa0] ss:$20 sps:$4 sm:$0xff]   ;;  %v1298_v55 = vld [vmem:[%s1730_s0 + $0xa8] ss:$20 sps:$4 sm:$0xff]   ;;  %v1305_v59 = vld [vmem:[%s1730_s0 + $0xd0] ss:$20 sps:$4 sm:$0xff]  }
  0x14   :  { %1072 = vmatpush3.bf16.msra.mxu0 %v1253_v18  ;;  %v1300_v56 = vld [vmem:[%s1730_s0 + $0xcc] ss:$20 sps:$4 sm:$0xff]   ;;  %v1302_v57 = vld [vmem:[%s1730_s0 + $0xd4] ss:$20 sps:$4 sm:$0xff]   ;;  %v1308_v61 = vld [vmem:[%s1730_s0 + $0xfc] ss:$20 sps:$4 sm:$0xff]  }
  0x15   :  { %1136 = vmatpush3.bf16.msra.mxu1 %v1254_v19  ;;  %1073 = vmatprep.subr.bf16.mxu0 %v1255_v20  ;;  %v1304_v58 = vld [vmem:[%s1730_s0 + $0xc8] ss:$20 sps:$4 sm:$0xff]   ;;  %v1310_v62 = vld [vmem:[%s1730_s0 + $0xf0] ss:$20 sps:$4 sm:$0xff]   ;;  %v1311_v63 = vld [vmem:[%s1730_s0 + $0xf8] ss:$20 sps:$4 sm:$0xff]  }
  0x16   :  { %1137 = vmatprep.subr.bf16.mxu1 %v1256_v21  ;;  %v1306_v60 = vld [vmem:[%s1730_s0 + $0xf4] ss:$20 sps:$4 sm:$0xff]   ;;  %v1313_v0 = vld [vmem:[%s1730_s0 + $0x11c] ss:$20 sps:$4 sm:$0xff]   ;;  %v1315_v1 = vld [vmem:[%s1730_s0 + $0x124] ss:$20 sps:$4 sm:$0xff]  }
  0x17   :  { %v1317_v2 = vld [vmem:[%s1730_s0 + $0x118] ss:$20 sps:$4 sm:$0xff]   ;;  %v1318_v3 = vld [vmem:[%s1730_s0 + $0x120] ss:$20 sps:$4 sm:$0xff]   ;;  %v1319_v4 = vld [vmem:[%s1730_s0 + $0x10] ss:$20 sps:$4 sm:$0xff]  }
  0x18   :  { %1074 = vmatpush3.bf16.msra.mxu0 %v1257_v22  ;;  %v1320_v5 = vld [vmem:[%s1730_s0 + $0xb0] ss:$20 sps:$4 sm:$0xff]   ;;  %v1321_v6 = vld [vmem:[%s1730_s0 + $0x38] ss:$20 sps:$4 sm:$0xff]   ;;  %v1323_v8 = vld [vmem:[%s1730_s0 + $0x60] ss:$20 sps:$4 sm:$0xff]  }
  0x19   :  { %1138 = vmatpush3.bf16.msra.mxu1 %v1258_v23  ;;  %1075 = vmatprep.subr.bf16.mxu0 %v1259_v24  ;;  %v1322_v7 = vld [vmem:[%s1730_s0 + $0xd8] ss:$20 sps:$4 sm:$0xff]   ;;  %v1324_v9 = vld [vmem:[%s1730_s0 + $0x100] ss:$20 sps:$4 sm:$0xff]   ;;  %v1325_v10 = vld [vmem:[%s1730_s0 + $0x88] ss:$20 sps:$4 sm:$0xff]  }
  0x1a   :  { %1139 = vmatprep.subr.bf16.mxu1 %v1260_v25  ;;  %v1326_v11 = vld [vmem:[%s1730_s0 + $0x128] ss:$20 sps:$4 sm:$0xff]  }
  0x1c   :  { %1076 = vmatpush3.bf16.msra.mxu0 %v1261_v26 }
  0x1d   :  { %1140 = vmatpush3.bf16.msra.mxu1 %v1262_v27  ;;  %1077 = vmatprep.subr.bf16.mxu0 %v1263_v28 }
  0x1e   :  { %1141 = vmatprep.subr.bf16.mxu1 %v1264_v29 }
  0x20   :  { %1078 = vmatpush3.bf16.msra.mxu0 %v1265_v30 }
  0x21   :  { %1142 = vmatpush3.bf16.msra.mxu1 %v1266_v31  ;;  %1203 = vmatprep.subr.bf16.mxu0 %v1273_v36 }
  0x22   :  { %1227 = vmatprep.subr.bf16.mxu1 %v1273_v36 }
  0x23   :  { %609 = vmatmul.mubr.bf16.vlgmr.msra.gmra.mrb[0].mxu0 %v1267_v32 }
  0x24   :  { %706 = vmatmul.mubr.bf16.vlgmr.msra.gmra.mrb[0].mxu1 %v1270_v34  ;;  %1204 = vmatpush3.bf16.msra.mxu0 %v1273_v36 }
  0x25   :  { %1231 = vmatpush3.bf16.msra.mxu1 %v1273_v36  ;;  %616 = vmatprep.mubr.bf16.mxu0 %v1274_v37 }
  0x26   :  { %713 = vmatprep.mubr.bf16.mxu1 %v1276_v38  ;;  %1205 = vmatprep.subr.bf16.mxu0 %v1286_v42 }
  0x27   :  { %1228 = vmatprep.subr.bf16.mxu1 %v1286_v42 }
  0x28   :  { %1206 = vmatpush3.bf16.msra.mxu0 %v1286_v42 }
  0x29   :  { %1232 = vmatpush3.bf16.msra.mxu1 %v1286_v42  ;;  %1207 = vmatprep.subr.bf16.mxu0 %v1299_v46 }
  0x2a   :  { %1229 = vmatprep.subr.bf16.mxu1 %v1299_v46 }
  0x2b   :  { %617 = vmatmul.mubr.bf16.gmra.mrb[4].mxu0 %v1278_v39 }
  0x2c   :  { %714 = vmatmul.mubr.bf16.gmra.mrb[4].mxu1 %v1279_v40  ;;  %624 = vmatprep.mubr.bf16.mxu0 %v1280_v41 }
  0x2d   :  { %721 = vmatprep.mubr.bf16.mxu1 %v1282_v43  ;;  %1208 = vmatpush3.bf16.msra.mxu0 %v1299_v46 }
  0x2e   :  { %1233 = vmatpush3.bf16.msra.mxu1 %v1299_v46  ;;  %1209 = vmatprep.subr.bf16.mxu0 %v1312_v49 }
  0x2f   :  { %1230 = vmatprep.subr.bf16.mxu1 %v1312_v49 }
  0x31   :  { %1210 = vmatpush3.bf16.msra.mxu0 %v1312_v49 }
  0x32   :  { %1234 = vmatpush3.bf16.msra.mxu1 %v1312_v49 }
  0x33   :  { %625 = vmatmul.mubr.bf16.gmra.mrb[8].mxu0 %v1284_v44 }
  0x34   :  { %722 = vmatmul.mubr.bf16.gmra.mrb[8].mxu1 %v1285_v45  ;;  %632 = vmatprep.mubr.bf16.mxu0 %v1287_v47 }
  0x35   :  { %729 = vmatprep.mubr.bf16.mxu1 %v1289_v48 }
  0x3b   :  { %633 = vmatmul.mubr.bf16.gmra.mrb[12].mxu0 %v1291_v50 }
  0x3c   :  { %730 = vmatmul.mubr.bf16.gmra.mrb[12].mxu1 %v1292_v51  ;;  %640 = vmatprep.mubr.bf16.mxu0 %v1293_v52 }
  0x3d   :  { %737 = vmatprep.mubr.bf16.mxu1 %v1295_v53 }
  0x43   :  { %641 = vmatmul.mubr.bf16.gmra.mrb[16].mxu0 %v1297_v54 }
  0x44   :  { %738 = vmatmul.mubr.bf16.gmra.mrb[16].mxu1 %v1298_v55  ;;  %648 = vmatprep.mubr.bf16.mxu0 %v1300_v56 }
  0x45   :  { %745 = vmatprep.mubr.bf16.mxu1 %v1302_v57 }
  0x4b   :  { %649 = vmatmul.mubr.bf16.gmra.mrb[20].mxu0 %v1304_v58 }
  0x4c   :  { %746 = vmatmul.mubr.bf16.gmra.mrb[20].mxu1 %v1305_v59  ;;  %656 = vmatprep.mubr.bf16.mxu0 %v1306_v60 }
  0x4d   :  { %753 = vmatprep.mubr.bf16.mxu1 %v1308_v61 }
  0x53   :  { %657 = vmatmul.mubr.bf16.gmra.mrb[24].mxu0 %v1310_v62 }
  0x54   :  { %754 = vmatmul.mubr.bf16.gmra.mrb[24].mxu1 %v1311_v63  ;;  %664 = vmatprep.mubr.bf16.mxu0 %v1313_v0 }
  0x55   :  { %761 = vmatprep.mubr.bf16.mxu1 %v1315_v1 }
  0x5b   :  { %665 = vmatmul.mubr.bf16.gmra.mrb[28].mxu0 %v1317_v2 }
  0x5c   :  { %762 = vmatmul.mubr.bf16.gmra.mrb[28].mxu1 %v1318_v3  ;;  %1211 = vmatprep.mubr.msk.bf16.mxu0 %vm551_vm0, %v1319_v4 }
  0x5d   :  { %1219 = vmatprep.mubr.msk.bf16.mxu1 %vm551_vm0, %v1320_v5 }
  0x63   :  { %1212 = vmatmul.mubr.msk.bf16.vlgmr.msra.gmra.mrb[32].mxu0 %vm551_vm0, %v1321_v6 }
  0x64   :  { %1220 = vmatmul.mubr.msk.bf16.vlgmr.msra.gmra.mrb[32].mxu1 %vm551_vm0, %v1322_v7  ;;  %1215 = vmatprep.mubr.msk.bf16.mxu0 %vm551_vm0, %v1323_v8 }
  0x65   :  { %1223 = vmatprep.mubr.msk.bf16.mxu1 %vm551_vm0, %v1324_v9 }
  0x6b   :  { %1216 = vmatmul.mubr.msk.bf16.gmra.mrb[36].mxu0 %vm551_vm0, %v1325_v10 }
  0x6c   :  { %1224 = vmatmul.mubr.msk.bf16.gmra.mrb[36].mxu1 %vm551_vm0, %v1326_v11 }
  0xf6   :  { %v1079_v12 = vpop.f32.mrb[0].mxu0 }
  0xf7   :  { %v1143_v13 = vpop.f32.mrb[0].mxu1  ;;  %v1080_v14 = vpop.f32.mrb[1].mxu0 }
  0xf8   :  { %v1081_v15 = vadd.f32 %v1080_v14, %v1079_v12  ;;  %v1144_v16 = vpop.f32.mrb[1].mxu1  ;;  %v1082_v17 = vpop.f32.mrb[2].mxu0 }
  0xf9   :  { %v1145_v18 = vadd.f32 %v1144_v16, %v1143_v13  ;;  %v1146_v19 = vpop.f32.mrb[2].mxu1  ;;  %v1083_v20 = vpop.f32.mrb[3].mxu0 }
  0xfa   :  { %v1084_v21 = vadd.f32 %v1083_v20, %v1082_v17  ;;  %v1147_v22 = vpop.f32.mrb[3].mxu1 }
  0xfb   :  { %v1148_v23 = vadd.f32 %v1147_v22, %v1146_v19  ;;  %v1583_v24 = vadd.f32 %v1145_v18, %v1081_v15 }
  0xfd   :  { %v1585_v25 = vadd.f32 %v1148_v23, %v1084_v21 }
  0xfe   :  { %v1085_v26 = vpop.f32.mrb[4].mxu0 }
  0xff   :  { %v1149_v27 = vpop.f32.mrb[4].mxu1  ;;  %v1086_v28 = vpop.f32.mrb[5].mxu0 }
 0x100   :  { %v1087_v29 = vadd.f32 %v1086_v28, %v1085_v26  ;;  %v1150_v30 = vpop.f32.mrb[5].mxu1  ;;  %v1088_v31 = vpop.f32.mrb[6].mxu0 }
 0x101   :  { %v1151_v32 = vadd.f32 %v1150_v30, %v1149_v27  ;;  %v1152_v33 = vpop.f32.mrb[6].mxu1  ;;  %v1089_v34 = vpop.f32.mrb[7].mxu0 }
 0x102   :  { %v1090_v35 = vadd.f32 %v1089_v34, %v1088_v31  ;;  %v1153_v36 = vpop.f32.mrb[7].mxu1 }
 0x103   :  { %v1154_v37 = vadd.f32 %v1153_v36, %v1152_v33  ;;  %v1587_v38 = vadd.f32 %v1151_v32, %v1087_v29 }
 0x105   :  { %v1589_v39 = vadd.f32 %v1154_v37, %v1090_v35 }
 0x106   :  { %v1091_v40 = vpop.f32.mrb[8].mxu0 }
 0x107   :  { %v1155_v41 = vpop.f32.mrb[8].mxu1  ;;  %v1092_v42 = vpop.f32.mrb[9].mxu0 }
 0x108   :  { %v1093_v43 = vadd.f32 %v1092_v42, %v1091_v40  ;;  %v1156_v44 = vpop.f32.mrb[9].mxu1  ;;  %v1094_v45 = vpop.f32.mrb[10].mxu0 }
 0x109   :  { %v1157_v46 = vadd.f32 %v1156_v44, %v1155_v41  ;;  %v1158_v47 = vpop.f32.mrb[10].mxu1  ;;  %v1095_v48 = vpop.f32.mrb[11].mxu0 }
 0x10a   :  { %v1096_v49 = vadd.f32 %v1095_v48, %v1094_v45  ;;  %v1159_v50 = vpop.f32.mrb[11].mxu1 }
 0x10b   :  { %v1160_v51 = vadd.f32 %v1159_v50, %v1158_v47  ;;  %v1591_v52 = vadd.f32 %v1157_v46, %v1093_v43 }
 0x10d   :  { %v1593_v53 = vadd.f32 %v1160_v51, %v1096_v49 }
 0x10e   :  { %v1097_v54 = vpop.f32.mrb[12].mxu0 }
 0x10f   :  { %v1161_v55 = vpop.f32.mrb[12].mxu1  ;;  %v1098_v56 = vpop.f32.mrb[13].mxu0 }
 0x110   :  { %v1099_v57 = vadd.f32 %v1098_v56, %v1097_v54  ;;  %v1162_v58 = vpop.f32.mrb[13].mxu1  ;;  %v1100_v59 = vpop.f32.mrb[14].mxu0 }
 0x111   :  { %v1163_v60 = vadd.f32 %v1162_v58, %v1161_v55  ;;  %v1164_v61 = vpop.f32.mrb[14].mxu1  ;;  %v1101_v62 = vpop.f32.mrb[15].mxu0 }
 0x112   :  { %v1102_v63 = vadd.f32 %v1101_v62, %v1100_v59  ;;  %v1165_v0 = vpop.f32.mrb[15].mxu1 }
 0x113   :  { %v1166_v1 = vadd.f32 %v1165_v0, %v1164_v61  ;;  %v1595_v2 = vadd.f32 %v1163_v60, %v1099_v57 }
 0x115   :  { %v1597_v3 = vadd.f32 %v1166_v1, %v1102_v63 }
 0x116   :  { %v1103_v4 = vpop.f32.mrb[16].mxu0 }
 0x117   :  { %v1167_v5 = vpop.f32.mrb[16].mxu1  ;;  %v1104_v6 = vpop.f32.mrb[17].mxu0 }
 0x118   :  { %v1105_v7 = vadd.f32 %v1104_v6, %v1103_v4  ;;  %v1168_v8 = vpop.f32.mrb[17].mxu1  ;;  %v1106_v9 = vpop.f32.mrb[18].mxu0 }
 0x119   :  { %v1169_v10 = vadd.f32 %v1168_v8, %v1167_v5  ;;  %v1170_v11 = vpop.f32.mrb[18].mxu1  ;;  %v1107_v12 = vpop.f32.mrb[19].mxu0  ;;  %v1612_v5 = vld [vmem:[%s1731_s2] ss:$0 sm:$0xff] }
 0x11a   :  { %v1108_v13 = vadd.f32 %v1107_v12, %v1106_v9  ;;  %v1171_v14 = vpop.f32.mrb[19].mxu1  ;;  %v1618_v9 = vld [vmem:[%s1731_s2 + $0x1] ss:$0 sm:$0xff] }
 0x11b   :  { %v1172_v15 = vadd.f32 %v1171_v14, %v1170_v11  ;;  %v740_v16 = vadd.f32 %v1169_v10, %v1105_v7 }
 0x11d   :  { %v1599_v17 = vadd.f32 %v1172_v15, %v1108_v13 }
 0x11e   :  { %v1109_v18 = vpop.f32.mrb[20].mxu0 }
 0x11f   :  { %v1173_v19 = vpop.f32.mrb[20].mxu1  ;;  %v1110_v20 = vpop.f32.mrb[21].mxu0 }
 0x120   :  { %v1111_v21 = vadd.f32 %v1110_v20, %v1109_v18  ;;  %v1174_v22 = vpop.f32.mrb[21].mxu1  ;;  %v1112_v23 = vpop.f32.mrb[22].mxu0 }
 0x121   :  { %v1175_v26 = vadd.f32 %v1174_v22, %v1173_v19  ;;  %v1176_v27 = vpop.f32.mrb[22].mxu1  ;;  %v1113_v28 = vpop.f32.mrb[23].mxu0 }
 0x122   :  { %v1114_v29 = vadd.f32 %v1113_v28, %v1112_v23  ;;  %v1177_v30 = vpop.f32.mrb[23].mxu1 }
 0x123   :  { %v1178_v31 = vadd.f32 %v1177_v30, %v1176_v27  ;;  %v748_v32 = vadd.f32 %v1175_v26, %v1111_v21 }
 0x125   :  { %v751_v33 = vadd.f32 %v1178_v31, %v1114_v29 }
 0x126   :  { %v1115_v34 = vpop.f32.mrb[24].mxu0 }
 0x127   :  { %v1179_v35 = vpop.f32.mrb[24].mxu1  ;;  %v1116_v36 = vpop.f32.mrb[25].mxu0 }
 0x128   :  { %v1117_v37 = vadd.f32 %v1116_v36, %v1115_v34  ;;  %v1180_v40 = vpop.f32.mrb[25].mxu1  ;;  %v1118_v41 = vpop.f32.mrb[26].mxu0 }
 0x129   :  { %v1181_v42 = vadd.f32 %v1180_v40, %v1179_v35  ;;  %v1182_v43 = vpop.f32.mrb[26].mxu1  ;;  %v1119_v44 = vpop.f32.mrb[27].mxu0 }
 0x12a   :  { %v1120_v45 = vadd.f32 %v1119_v44, %v1118_v41  ;;  %v1183_v46 = vpop.f32.mrb[27].mxu1 }
 0x12b   :  { %v1184_v47 = vadd.f32 %v1183_v46, %v1182_v43  ;;  %v1601_v48 = vadd.f32 %v1181_v42, %v1117_v37 }
 0x12d   :  { %v1603_v49 = vadd.f32 %v1184_v47, %v1120_v45 }
 0x12e   :  { %v1121_v50 = vpop.f32.mrb[28].mxu0 }
 0x12f   :  { %v1185_v51 = vpop.f32.mrb[28].mxu1  ;;  %v1122_v54 = vpop.f32.mrb[29].mxu0 }
 0x130   :  { %v1123_v55 = vadd.f32 %v1122_v54, %v1121_v50  ;;  %v1186_v56 = vpop.f32.mrb[29].mxu1  ;;  %v1124_v57 = vpop.f32.mrb[30].mxu0 }
 0x131   :  { %v1187_v58 = vadd.f32 %v1186_v56, %v1185_v51  ;;  %v1188_v59 = vpop.f32.mrb[30].mxu1  ;;  %v1125_v60 = vpop.f32.mrb[31].mxu0 }
 0x132   :  { %v1126_v61 = vadd.f32 %v1125_v60, %v1124_v57  ;;  %v1189_v62 = vpop.f32.mrb[31].mxu1 }
 0x133   :  { %v1190_v63 = vadd.f32 %v1189_v62, %v1188_v59  ;;  %v1605_v0 = vadd.f32 %v1187_v58, %v1123_v55 }
 0x135   :  { %v1607_v1 = vadd.f32 %v1190_v63, %v1126_v61 }
 0x136   :  { %v1213_v4 = vpop.f32.mrb[32].mxu0 }
 0x137   :  { %v813_v6 = vadd.f32 %v1213_v4, %v1587_v38  ;;  %v1221_v7 = vpop.f32.mrb[32].mxu1  ;;  %v804_v8 = vpop.f32.mrb[33].mxu0 }
 0x138   :  { %v845_v10 = vadd.f32 %v1221_v7, %v748_v32  ;;  %v805_v11 = vadd.f32 %v804_v8, %v1583_v24  ;;  %v836_v12 = vpop.f32.mrb[33].mxu1  ;;  %v1214_v13 = vpop.f32.mrb[34].mxu0 }
 0x139   :  { %v874_v14 = vmul.f32 %v1612_v5, %v813_v6  ;;  %v837_v15 = vadd.f32 %v836_v12, %v740_v16  ;;  %v816_v18 = vadd.f32 %v1214_v13, %v1589_v39  ;;  %v1222_v19 = vpop.f32.mrb[34].mxu1  ;;  %v807_v20 = vpop.f32.mrb[35].mxu0 }
 0x13a   :  { %v882_v38 = vmul.f32 %v1612_v5, %v845_v10  ;;  %v872_v21 = vmul.f32 %v1612_v5, %v805_v11  ;;  %v848_v22 = vadd.f32 %v1222_v19, %v751_v33  ;;  %v808_v23 = vadd.f32 %v807_v20, %v1585_v25  ;;  %v839_v26 = vpop.f32.mrb[35].mxu1 }
 0x13b   :  { %v895_v27 = vadd.f32 %v1618_v9, %v874_v14  ;;  %v880_v24 = vmul.f32 %v1612_v5, %v837_v15  ;;  %v875_v28 = vmul.f32 %v1612_v5, %v816_v18  ;;  %v840_v16 = vadd.f32 %v839_v26, %v1599_v17 }
 0x13c   :  { %v903_v39 = vadd.f32 %v1618_v9, %v882_v38  ;;  %v893_v29 = vadd.f32 %v1618_v9, %v872_v21  ;;  %v883_v30 = vmul.f32 %v1612_v5, %v848_v22  ;;  %v873_v31 = vmul.f32 %v1612_v5, %v808_v23 }
 0x13d   :  { %vm911_vm1 = vcmp.ge.f32.partialorder %v895_v27, 0.0  ;;  %v927_v32 = vmul.f32 0.2, %v895_v27  ;;  %v901_v25 = vadd.f32 %v1618_v9, %v880_v24  ;;  %v896_v33 = vadd.f32 %v1618_v9, %v875_v28 }
 0x13e   :  { %vm919_vm2 = vcmp.ge.f32.partialorder %v903_v39, 0.0  ;;  %v935_v34 = vmul.f32 0.2, %v903_v39  ;;  %vm909_vm3 = vcmp.ge.f32.partialorder %v893_v29, 0.0  ;;  %v925_v35 = vmul.f32 0.2, %v893_v29 }
 0x13f   :  { %v943_v36 = vsel %vm911_vm1, %v895_v27, %v927_v32  ;;  %vm917_vm4 = vcmp.ge.f32.partialorder %v901_v25, 0.0  ;;  %v933_v17 = vmul.f32 0.2, %v901_v25  ;;  %vm912_vm5 = vcmp.ge.f32.partialorder %v896_v33, 0.0  ;;  %v1217_v37 = vpop.f32.mrb[36].mxu0  ;;  %v1225_v40 = vpop.f32.mrb[36].mxu1 }
 0x140   :  { %959 = vst.msk [vmem:[%s1732_s3 + $0x10] sm:$0xff] %vm551_vm0, %v943_v36  ;;  %v951_v41 = vsel %vm919_vm2, %v903_v39, %v935_v34  ;;  %v941_v42 = vsel %vm909_vm3, %v893_v29, %v925_v35  ;;  %v928_v43 = vmul.f32 0.2, %v896_v33  ;;  %v904_v44 = vadd.f32 %v1618_v9, %v883_v30  ;;  %v820_v45 = vpop.f32.mrb[37].mxu0  ;;  %v852_v46 = vpop.f32.mrb[37].mxu1 }
 0x141   :  { %967 = vst.msk [vmem:[%s1732_s3 + $0x50] sm:$0xff] %vm551_vm0, %v951_v41  ;;  %957 = vst.msk [vmem:[%s1732_s3] sm:$0xff] %vm551_vm0, %v941_v42  ;;  %v949_v47 = vsel %vm917_vm4, %v901_v25, %v933_v17  ;;  %v894_v50 = vadd.f32 %v1618_v9, %v873_v31  ;;  %v881_v51 = vmul.f32 %v1612_v5, %v840_v16  ;;  %v1218_v55 = vpop.f32.mrb[38].mxu0  ;;  %v1226_v56 = vpop.f32.mrb[38].mxu1 }
 0x142   :  { %v829_v54 = vadd.f32 %v1217_v37, %v1595_v2  ;;  %965 = vst.msk [vmem:[%s1732_s3 + $0x40] sm:$0xff] %vm551_vm0, %v949_v47  ;;  %v944_v57 = vsel %vm912_vm5, %v896_v33, %v928_v43  ;;  %vm920_vm6 = vcmp.ge.f32.partialorder %v904_v44, 0.0  ;;  %v936_v58 = vmul.f32 0.2, %v904_v44  ;;  %v823_v60 = vpop.f32.mrb[39].mxu0  ;;  %v855_v61 = vpop.f32.mrb[39].mxu1 }
 0x143   :  { %v861_v59 = vadd.f32 %v1225_v40, %v1605_v0  ;;  %960 = vst.msk [vmem:[%s1732_s3 + $0x18] sm:$0xff] %vm551_vm0, %v944_v57  ;;  %vm910_vm7 = vcmp.ge.f32.partialorder %v894_v50, 0.0  ;;  %v926_v2 = vmul.f32 0.2, %v894_v50  ;;  %v902_v62 = vadd.f32 %v1618_v9, %v881_v51 }
 0x144   :  { %v878_v63 = vmul.f32 %v1612_v5, %v829_v54  ;;  %v952_v4 = vsel %vm920_vm6, %v904_v44, %v936_v58  ;;  %v821_v7 = vadd.f32 %v820_v45, %v1591_v52  ;;  %v853_v0 = vadd.f32 %v852_v46, %v1601_v48 }
 0x145   :  { %v886_v6 = vmul.f32 %v1612_v5, %v861_v59  ;;  %968 = vst.msk [vmem:[%s1732_s3 + $0x58] sm:$0xff] %vm551_vm0, %v952_v4  ;;  %v942_v8 = vsel %vm910_vm7, %v894_v50, %v926_v2  ;;  %vm918_vm8 = vcmp.ge.f32.partialorder %v902_v62, 0.0  ;;  %v934_v10 = vmul.f32 0.2, %v902_v62 }
 0x146   :  { %v899_v11 = vadd.f32 %v1618_v9, %v878_v63  ;;  %958 = vst.msk [vmem:[%s1732_s3 + $0x8] sm:$0xff] %vm551_vm0, %v942_v8  ;;  %v876_v52 = vmul.f32 %v1612_v5, %v821_v7  ;;  %v884_v48 = vmul.f32 %v1612_v5, %v853_v0  ;;  %v832_v13 = vadd.f32 %v1218_v55, %v1597_v3 }
 0x147   :  { %v907_v12 = vadd.f32 %v1618_v9, %v886_v6  ;;  %v950_v14 = vsel %vm918_vm8, %v902_v62, %v934_v10  ;;  %v864_v18 = vadd.f32 %v1226_v56, %v1607_v1  ;;  %v824_v23 = vadd.f32 %v823_v60, %v1593_v53 }
 0x148   :  { %vm915_vm9 = vcmp.ge.f32.partialorder %v899_v11, 0.0  ;;  %v931_v15 = vmul.f32 0.2, %v899_v11  ;;  %966 = vst.msk [vmem:[%s1732_s3 + $0x48] sm:$0xff] %vm551_vm0, %v950_v14  ;;  %v897_v20 = vadd.f32 %v1618_v9, %v876_v52  ;;  %v905_v38 = vadd.f32 %v1618_v9, %v884_v48 }
 0x149   :  { %vm923_vm10 = vcmp.ge.f32.partialorder %v907_v12, 0.0  ;;  %v939_v19 = vmul.f32 0.2, %v907_v12  ;;  %v879_v22 = vmul.f32 %v1612_v5, %v832_v13  ;;  %v887_v3 = vmul.f32 %v1612_v5, %v864_v18 }
 0x14a   :  { %v947_v21 = vsel %vm915_vm9, %v899_v11, %v931_v15  ;;  %vm913_vm11 = vcmp.ge.f32.partialorder %v897_v20, 0.0  ;;  %v929_v26 = vmul.f32 0.2, %v897_v20  ;;  %vm921_vm12 = vcmp.ge.f32.partialorder %v905_v38, 0.0 }
 0x14b   :  { %963 = vst.msk [vmem:[%s1732_s3 + $0x30] sm:$0xff] %vm551_vm0, %v947_v21  ;;  %v955_v1 = vsel %vm923_vm10, %v907_v12, %v939_v19  ;;  %v937_v27 = vmul.f32 0.2, %v905_v38  ;;  %v900_v24 = vadd.f32 %v1618_v9, %v879_v22  ;;  %v908_v28 = vadd.f32 %v1618_v9, %v887_v3 }
 0x14c   :  { %971 = vst.msk [vmem:[%s1732_s3 + $0x70] sm:$0xff] %vm551_vm0, %v955_v1  ;;  %v877_v53 = vmul.f32 %v1612_v5, %v824_v23  ;;  %v945_v16 = vsel %vm913_vm11, %v897_v20, %v929_v26  ;;  %v856_v39 = vadd.f32 %v855_v61, %v1603_v49 }
 0x14d   :  { %961 = vst.msk [vmem:[%s1732_s3 + $0x20] sm:$0xff] %vm551_vm0, %v945_v16  ;;  %v953_v29 = vsel %vm921_vm12, %v905_v38, %v937_v27  ;;  %vm916_vm13 = vcmp.ge.f32.partialorder %v900_v24, 0.0  ;;  %v932_v30 = vmul.f32 0.2, %v900_v24  ;;  %vm924_vm14 = vcmp.ge.f32.partialorder %v908_v28, 0.0 }
 0x14e   :  { %969 = vst.msk [vmem:[%s1732_s3 + $0x60] sm:$0xff] %vm551_vm0, %v953_v29  ;;  %v940_v31 = vmul.f32 0.2, %v908_v28  ;;  %v898_v32 = vadd.f32 %v1618_v9, %v877_v53  ;;  %v885_v25 = vmul.f32 %v1612_v5, %v856_v39 }
 0x14f   :  { %v948_v49 = vsel %vm916_vm13, %v900_v24, %v932_v30 }
 0x150   :  { %964 = vst.msk [vmem:[%s1732_s3 + $0x38] sm:$0xff] %vm551_vm0, %v948_v49  ;;  %v956_v33 = vsel %vm924_vm14, %v908_v28, %v940_v31  ;;  %vm914_vm15 = vcmp.ge.f32.partialorder %v898_v32, 0.0  ;;  %v930_v34 = vmul.f32 0.2, %v898_v32  ;;  %v906_v35 = vadd.f32 %v1618_v9, %v885_v25 }
 0x151   :  { %972 = vst.msk [vmem:[%s1732_s3 + $0x78] sm:$0xff] %vm551_vm0, %v956_v33 }
 0x152   :  { %v946_v36 = vsel %vm914_vm15, %v898_v32, %v930_v34  ;;  %vm922_vm1 = vcmp.ge.f32.partialorder %v906_v35, 0.0  ;;  %v938_v17 = vmul.f32 0.2, %v906_v35 }
 0x153   :  { %962 = vst.msk [vmem:[%s1732_s3 + $0x28] sm:$0xff] %vm551_vm0, %v946_v36 }
 0x154   :  { %v954_v5 = vsel %vm922_vm1, %v906_v35, %v938_v17 }
 0x155   :  { %970 = vst.msk [vmem:[%s1732_s3 + $0x68] sm:$0xff] %vm551_vm0, %v954_v5 }

// kernel: fcdiscriminator_sod_forward.7
= control target key start
LH: loop header
LB: loop body
LE: loop exit
PB: predicated region body
PF: predicated region fallthrough
CT: control target
= control target key end

     0   :  { %vm365_vm0 = vcmask 523264   ;;  %s913_s1 = inlined_call_operand.vmem [shape: bf16[576,64], index: 1, kind: input, shape index: {}]   ;;  %s914_s0 = inlined_call_operand.vmem [shape: bf16[32,576], index: 0, kind: input, shape index: {}]   ;;  %s915_s2 = inlined_call_operand.vmem [shape: f32[2,64], index: 2, kind: input, shape index: {}]   ;;  %s916_s3 = inlined_call_operand.vmem [shape: f32[32,64], index: 3, kind: output, shape index: {}]  }
   0x1   :  { %v681_v0 = vld [vmem:[%s913_s1 + $0x40] sm:$0xff]   ;;  %v685_v4 = vld [vmem:[%s913_s1 + $0x48] sm:$0xff]   ;;  %v689_v8 = vld [vmem:[%s913_s1 + $0x50] sm:$0xff]  }
   0x2   :  { %v682_v1 = vld [vmem:[%s913_s1 + $0xc0] sm:$0xff]   ;;  %607 = vmatprep.subr.bf16.mxu0 %v681_v0  ;;  %v686_v5 = vld [vmem:[%s913_s1 + $0xc8] sm:$0xff]   ;;  %v690_v9 = vld [vmem:[%s913_s1 + $0xd0] sm:$0xff]  }
   0x3   :  { %v683_v2 = vld [vmem:[%s913_s1] sm:$0xff]   ;;  %635 = vmatprep.subr.bf16.mxu1 %v682_v1  ;;  %v687_v6 = vld [vmem:[%s913_s1 + $0x8] sm:$0xff]   ;;  %v691_v10 = vld [vmem:[%s913_s1 + $0x10] sm:$0xff]  }
   0x4   :  { %v684_v3 = vld [vmem:[%s913_s1 + $0x80] sm:$0xff]   ;;  %608 = vmatpush3.bf16.msra.mxu0 %v683_v2  ;;  %v688_v7 = vld [vmem:[%s913_s1 + $0x88] sm:$0xff]   ;;  %v692_v11 = vld [vmem:[%s913_s1 + $0x90] sm:$0xff]  }
   0x5   :  { %636 = vmatpush3.bf16.msra.mxu1 %v684_v3  ;;  %609 = vmatprep.subr.bf16.mxu0 %v685_v4  ;;  %v693_v12 = vld [vmem:[%s913_s1 + $0x58] sm:$0xff]   ;;  %v697_v16 = vld [vmem:[%s913_s1 + $0x60] sm:$0xff]   ;;  %v701_v20 = vld [vmem:[%s913_s1 + $0x68] sm:$0xff]  }
   0x6   :  { %637 = vmatprep.subr.bf16.mxu1 %v686_v5  ;;  %v694_v13 = vld [vmem:[%s913_s1 + $0xd8] sm:$0xff]   ;;  %v698_v17 = vld [vmem:[%s913_s1 + $0xe0] sm:$0xff]   ;;  %v702_v21 = vld [vmem:[%s913_s1 + $0xe8] sm:$0xff]  }
   0x7   :  { %v695_v14 = vld [vmem:[%s913_s1 + $0x18] sm:$0xff]   ;;  %v699_v18 = vld [vmem:[%s913_s1 + $0x20] sm:$0xff]   ;;  %v703_v22 = vld [vmem:[%s913_s1 + $0x28] sm:$0xff]  }
   0x8   :  { %610 = vmatpush3.bf16.msra.mxu0 %v687_v6  ;;  %v696_v15 = vld [vmem:[%s913_s1 + $0x98] sm:$0xff]   ;;  %v700_v19 = vld [vmem:[%s913_s1 + $0xa0] sm:$0xff]   ;;  %v704_v23 = vld [vmem:[%s913_s1 + $0xa8] sm:$0xff]  }
   0x9   :  { %638 = vmatpush3.bf16.msra.mxu1 %v688_v7  ;;  %611 = vmatprep.subr.bf16.mxu0 %v689_v8  ;;  %v705_v24 = vld [vmem:[%s913_s1 + $0x70] sm:$0xff]   ;;  %v709_v28 = vld [vmem:[%s913_s1 + $0x78] sm:$0xff]   ;;  %v718_v35 = vld [vmem:[%s914_s0 + $0xc] ss:$20 sps:$4 sm:$0xff]  }
   0xa   :  { %639 = vmatprep.subr.bf16.mxu1 %v690_v9  ;;  %v706_v25 = vld [vmem:[%s913_s1 + $0xf0] sm:$0xff]   ;;  %v710_v29 = vld [vmem:[%s913_s1 + $0xf8] sm:$0xff]   ;;  %v719_v36 = vld [vmem:[%s913_s1 + $0x100] sm:$0xff]   ;;  %453 = vmatprep.mubr.bf16.mxu1 %v718_v35 }
   0xb   :  { %v707_v26 = vld [vmem:[%s913_s1 + $0x30] sm:$0xff]   ;;  %v711_v30 = vld [vmem:[%s913_s1 + $0x38] sm:$0xff]   ;;  %v720_v37 = vld [vmem:[%s913_s1 + $0x108] sm:$0xff]  }
   0xc   :  { %612 = vmatpush3.bf16.msra.mxu0 %v691_v10  ;;  %v708_v27 = vld [vmem:[%s913_s1 + $0xb0] sm:$0xff]   ;;  %v712_v31 = vld [vmem:[%s913_s1 + $0xb8] sm:$0xff]   ;;  %v721_v38 = vld [vmem:[%s914_s0 + $0x2c] ss:$20 sps:$4 sm:$0xff]  }
   0xd   :  { %640 = vmatpush3.bf16.msra.mxu1 %v692_v11  ;;  %613 = vmatprep.subr.bf16.mxu0 %v693_v12  ;;  %v713_v32 = vld [vmem:[%s914_s0] ss:$20 sps:$4 sm:$0xff]   ;;  %v715_v33 = vld [vmem:[%s914_s0 + $0x4] ss:$20 sps:$4 sm:$0xff]   ;;  %v716_v34 = vld [vmem:[%s914_s0 + $0x8] ss:$20 sps:$4 sm:$0xff]  }
   0xe   :  { %641 = vmatprep.subr.bf16.mxu1 %v694_v13  ;;  %404 = vmatprep.mubr.bf16.mxu0 %v715_v33  ;;  %v723_v39 = vld [vmem:[%s914_s0 + $0x34] ss:$20 sps:$4 sm:$0xff]   ;;  %v726_v42 = vld [vmem:[%s914_s0 + $0x30] ss:$20 sps:$4 sm:$0xff]   ;;  %v728_v44 = vld [vmem:[%s913_s1 + $0x118] sm:$0xff]  }
   0xf   :  { %v725_v40 = vld [vmem:[%s914_s0 + $0x28] ss:$20 sps:$4 sm:$0xff]   ;;  %v727_v41 = vld [vmem:[%s913_s1 + $0x110] sm:$0xff]   ;;  %v730_v45 = vld [vmem:[%s914_s0 + $0x38] ss:$20 sps:$4 sm:$0xff]  }
  0x10   :  { %614 = vmatpush3.bf16.msra.mxu0 %v695_v14  ;;  %v729_v43 = vld [vmem:[%s914_s0 + $0x10] ss:$20 sps:$4 sm:$0xff]   ;;  %v605_v11 = vld [vmem:[%s915_s2] ss:$0 sm:$0xff]  ;;  %v606_v14 = vld [vmem:[%s915_s2 + $0x1] ss:$0 sm:$0xff] }
  0x11   :  { %642 = vmatpush3.bf16.msra.mxu1 %v696_v15  ;;  %615 = vmatprep.subr.bf16.mxu0 %v697_v16 }
  0x12   :  { %643 = vmatprep.subr.bf16.mxu1 %v698_v17 }
  0x14   :  { %616 = vmatpush3.bf16.msra.mxu0 %v699_v18 }
  0x15   :  { %644 = vmatpush3.bf16.msra.mxu1 %v700_v19  ;;  %617 = vmatprep.subr.bf16.mxu0 %v701_v20 }
  0x16   :  { %645 = vmatprep.subr.bf16.mxu1 %v702_v21 }
  0x18   :  { %618 = vmatpush3.bf16.msra.mxu0 %v703_v22 }
  0x19   :  { %646 = vmatpush3.bf16.msra.mxu1 %v704_v23  ;;  %619 = vmatprep.subr.bf16.mxu0 %v705_v24 }
  0x1a   :  { %647 = vmatprep.subr.bf16.mxu1 %v706_v25 }
  0x1c   :  { %620 = vmatpush3.bf16.msra.mxu0 %v707_v26 }
  0x1d   :  { %648 = vmatpush3.bf16.msra.mxu1 %v708_v27  ;;  %621 = vmatprep.subr.bf16.mxu0 %v709_v28 }
  0x1e   :  { %649 = vmatprep.subr.bf16.mxu1 %v710_v29 }
  0x20   :  { %622 = vmatpush3.bf16.msra.mxu0 %v711_v30 }
  0x21   :  { %650 = vmatpush3.bf16.msra.mxu1 %v712_v31  ;;  %669 = vmatprep.subr.bf16.mxu0 %v719_v36 }
  0x23   :  { %405 = vmatmul.mubr.bf16.vlgmr.msra.gmra.mrb[0].mxu0 %v713_v32 }
  0x24   :  { %454 = vmatmul.mubr.bf16.vlgmr.msra.gmra.mrb[0].mxu1 %v716_v34  ;;  %670 = vmatpush3.bf16.msra.mxu0 %v719_v36 }
  0x25   :  { %671 = vmatprep.subr.bf16.mxu0 %v720_v37  ;;  %412 = vmatprep.mubr.bf16.mxu0 %v721_v38 }
  0x26   :  { %461 = vmatprep.mubr.bf16.mxu1 %v723_v39 }
  0x28   :  { %672 = vmatpush3.bf16.msra.mxu0 %v720_v37 }
  0x29   :  { %673 = vmatprep.subr.bf16.mxu0 %v727_v41 }
  0x2b   :  { %413 = vmatmul.mubr.bf16.gmra.mrb[4].mxu0 %v725_v40 }
  0x2c   :  { %462 = vmatmul.mubr.bf16.gmra.mrb[4].mxu1 %v726_v42  ;;  %677 = vmatprep.mubr.msk.bf16.mxu0 %vm365_vm0, %v729_v43 }
  0x2d   :  { %674 = vmatpush3.bf16.msra.mxu0 %v727_v41 }
  0x2e   :  { %675 = vmatprep.subr.bf16.mxu0 %v728_v44 }
  0x31   :  { %676 = vmatpush3.bf16.msra.mxu0 %v728_v44 }
  0x34   :  { %678 = vmatmul.mubr.msk.bf16.vlgmr.msra.gmra.mrb[8].mxu0 %vm365_vm0, %v730_v45 }
  0xf6   :  { %v623_v46 = vpop.f32.mrb[0].mxu0 }
  0xf7   :  { %v651_v47 = vpop.f32.mrb[0].mxu1  ;;  %v624_v48 = vpop.f32.mrb[1].mxu0 }
  0xf8   :  { %v625_v49 = vadd.f32 %v624_v48, %v623_v46  ;;  %v652_v50 = vpop.f32.mrb[1].mxu1  ;;  %v626_v51 = vpop.f32.mrb[2].mxu0 }
  0xf9   :  { %v653_v52 = vadd.f32 %v652_v50, %v651_v47  ;;  %v654_v53 = vpop.f32.mrb[2].mxu1  ;;  %v627_v54 = vpop.f32.mrb[3].mxu0 }
  0xfa   :  { %v628_v55 = vadd.f32 %v627_v54, %v626_v51  ;;  %v655_v56 = vpop.f32.mrb[3].mxu1 }
  0xfb   :  { %v656_v57 = vadd.f32 %v655_v56, %v654_v53  ;;  %v456_v58 = vadd.f32 %v653_v52, %v625_v49 }
  0xfd   :  { %v459_v59 = vadd.f32 %v656_v57, %v628_v55 }
  0xfe   :  { %v629_v60 = vpop.f32.mrb[4].mxu0 }
  0xff   :  { %v657_v61 = vpop.f32.mrb[4].mxu1  ;;  %v630_v62 = vpop.f32.mrb[5].mxu0 }
 0x100   :  { %v631_v63 = vadd.f32 %v630_v62, %v629_v60  ;;  %v658_v0 = vpop.f32.mrb[5].mxu1  ;;  %v632_v1 = vpop.f32.mrb[6].mxu0 }
 0x101   :  { %v659_v2 = vadd.f32 %v658_v0, %v657_v61  ;;  %v660_v3 = vpop.f32.mrb[6].mxu1  ;;  %v633_v4 = vpop.f32.mrb[7].mxu0 }
 0x102   :  { %v634_v5 = vadd.f32 %v633_v4, %v632_v1  ;;  %v661_v6 = vpop.f32.mrb[7].mxu1 }
 0x103   :  { %v662_v7 = vadd.f32 %v661_v6, %v660_v3  ;;  %v464_v8 = vadd.f32 %v659_v2, %v631_v63 }
 0x105   :  { %v467_v9 = vadd.f32 %v662_v7, %v634_v5 }
 0x107   :  { %v679_v10 = vpop.f32.mrb[8].mxu0 }
 0x108   :  { %v513_v12 = vadd.f32 %v679_v10, %v464_v8  ;;  %v504_v13 = vpop.f32.mrb[9].mxu0 }
 0x109   :  { %v505_v15 = vadd.f32 %v504_v13, %v456_v58  ;;  %v680_v16 = vpop.f32.mrb[10].mxu0 }
 0x10a   :  { %v526_v17 = vmul.f32 %v605_v11, %v513_v12  ;;  %v516_v18 = vadd.f32 %v680_v16, %v467_v9  ;;  %v507_v19 = vpop.f32.mrb[11].mxu0 }
 0x10b   :  { %v524_v20 = vmul.f32 %v605_v11, %v505_v15  ;;  %v508_v21 = vadd.f32 %v507_v19, %v459_v59 }
 0x10c   :  { %v535_v22 = vadd.f32 %v606_v14, %v526_v17  ;;  %v527_v23 = vmul.f32 %v605_v11, %v516_v18 }
 0x10d   :  { %v533_v24 = vadd.f32 %v606_v14, %v524_v20  ;;  %v525_v25 = vmul.f32 %v605_v11, %v508_v21 }
 0x10e   :  { %vm539_vm1 = vcmp.ge.f32.partialorder %v535_v22, 0.0  ;;  %v543_v26 = vmul.f32 0.2, %v535_v22  ;;  %v536_v27 = vadd.f32 %v606_v14, %v527_v23 }
 0x10f   :  { %vm537_vm2 = vcmp.ge.f32.partialorder %v533_v24, 0.0  ;;  %v541_v28 = vmul.f32 0.2, %v533_v24  ;;  %v534_v29 = vadd.f32 %v606_v14, %v525_v25 }
 0x110   :  { %v547_v30 = vsel %vm539_vm1, %v535_v22, %v543_v26  ;;  %vm540_vm3 = vcmp.ge.f32.partialorder %v536_v27, 0.0  ;;  %v544_v31 = vmul.f32 0.2, %v536_v27 }
 0x111   :  { %551 = vst.msk [vmem:[%s916_s3 + $0x10] sm:$0xff] %vm365_vm0, %v547_v30  ;;  %v545_v32 = vsel %vm537_vm2, %v533_v24, %v541_v28  ;;  %vm538_vm4 = vcmp.ge.f32.partialorder %v534_v29, 0.0  ;;  %v542_v33 = vmul.f32 0.2, %v534_v29 }
 0x112   :  { %549 = vst.msk [vmem:[%s916_s3] sm:$0xff] %vm365_vm0, %v545_v32  ;;  %v548_v34 = vsel %vm540_vm3, %v536_v27, %v544_v31 }
 0x113   :  { %552 = vst.msk [vmem:[%s916_s3 + $0x18] sm:$0xff] %vm365_vm0, %v548_v34  ;;  %v546_v35 = vsel %vm538_vm4, %v534_v29, %v542_v33 }
 0x114   :  { %550 = vst.msk [vmem:[%s916_s3 + $0x8] sm:$0xff] %vm365_vm0, %v546_v35 }

// kernel: fcdiscriminator_sod_forward.9
= control target key start
LH: loop header
LB: loop body
LE: loop exit
PB: predicated region body
PF: predicated region fallthrough
CT: control target
= control target key end

     0   :  { %v613_v36 = vmov 0.0   ;;  %vm614_vm0 = vmmov 0   ;;  %vm323_vm1 = vcmask 523264   ;;  %vm459_vm2 = vcmask 7168   ;;  %s761_s1 = inlined_call_operand.vmem [shape: bf16[576,1], index: 1, kind: input, shape index: {}]   ;;  %s762_s0 = inlined_call_operand.vmem [shape: bf16[8,576], index: 0, kind: input, shape index: {}]   ;;  %s763_s2 = inlined_call_operand.vmem [shape: f32[2,1], index: 2, kind: input, shape index: {}]   ;;  %s764_s3 = inlined_call_operand.vmem [shape: f32[8,1], index: 3, kind: output, shape index: {}]  }
   0x1   :  { %v572_v0 = vld [vmem:[%s761_s1 + $0x40] sm:$0xff]   ;;  %v576_v4 = vld [vmem:[%s761_s1 + $0x48] sm:$0xff]   ;;  %v580_v8 = vld [vmem:[%s761_s1 + $0x50] sm:$0xff]  }
   0x2   :  { %v573_v1 = vld [vmem:[%s761_s1 + $0xc0] sm:$0xff]   ;;  %509 = vmatprep.subr.bf16.mxu0 %v572_v0  ;;  %v577_v5 = vld [vmem:[%s761_s1 + $0xc8] sm:$0xff]   ;;  %v581_v9 = vld [vmem:[%s761_s1 + $0xd0] sm:$0xff]  }
   0x3   :  { %v574_v2 = vld [vmem:[%s761_s1] sm:$0xff]   ;;  %531 = vmatprep.subr.bf16.mxu1 %v573_v1  ;;  %v578_v6 = vld [vmem:[%s761_s1 + $0x8] sm:$0xff]   ;;  %v582_v10 = vld [vmem:[%s761_s1 + $0x10] sm:$0xff]  }
   0x4   :  { %v575_v3 = vld [vmem:[%s761_s1 + $0x80] sm:$0xff]   ;;  %510 = vmatpush3.bf16.msra.mxu0 %v574_v2  ;;  %v579_v7 = vld [vmem:[%s761_s1 + $0x88] sm:$0xff]   ;;  %v583_v11 = vld [vmem:[%s761_s1 + $0x90] sm:$0xff]  }
   0x5   :  { %532 = vmatpush3.bf16.msra.mxu1 %v575_v3  ;;  %511 = vmatprep.subr.bf16.mxu0 %v576_v4  ;;  %v584_v12 = vld [vmem:[%s761_s1 + $0x58] sm:$0xff]   ;;  %v588_v16 = vld [vmem:[%s761_s1 + $0x60] sm:$0xff]   ;;  %v592_v20 = vld [vmem:[%s761_s1 + $0x68] sm:$0xff]  }
   0x6   :  { %533 = vmatprep.subr.bf16.mxu1 %v577_v5  ;;  %v585_v13 = vld [vmem:[%s761_s1 + $0xd8] sm:$0xff]   ;;  %v589_v17 = vld [vmem:[%s761_s1 + $0xe0] sm:$0xff]   ;;  %v593_v21 = vld [vmem:[%s761_s1 + $0xe8] sm:$0xff]  }
   0x7   :  { %v586_v14 = vld [vmem:[%s761_s1 + $0x18] sm:$0xff]   ;;  %v590_v18 = vld [vmem:[%s761_s1 + $0x20] sm:$0xff]   ;;  %v594_v22 = vld [vmem:[%s761_s1 + $0x28] sm:$0xff]  }
   0x8   :  { %512 = vmatpush3.bf16.msra.mxu0 %v578_v6  ;;  %v587_v15 = vld [vmem:[%s761_s1 + $0x98] sm:$0xff]   ;;  %v591_v19 = vld [vmem:[%s761_s1 + $0xa0] sm:$0xff]   ;;  %v595_v23 = vld [vmem:[%s761_s1 + $0xa8] sm:$0xff]  }
   0x9   :  { %534 = vmatpush3.bf16.msra.mxu1 %v579_v7  ;;  %513 = vmatprep.subr.bf16.mxu0 %v580_v8  ;;  %v596_v24 = vld [vmem:[%s761_s1 + $0x70] sm:$0xff]   ;;  %v600_v28 = vld [vmem:[%s761_s1 + $0x78] sm:$0xff]   ;;  %v15_v32 = vld [vmem:[%s762_s0] sm:$0xff] }
   0xa   :  { %535 = vmatprep.subr.bf16.mxu1 %v581_v9  ;;  %v597_v25 = vld [vmem:[%s761_s1 + $0xf0] sm:$0xff]   ;;  %v601_v29 = vld [vmem:[%s761_s1 + $0xf8] sm:$0xff]   ;;  %v465_v33 = vcombine.low %v15_v32, %v15_v32  ;;  %v466_v34 = vcombine.high %v15_v32, %v15_v32  ;;  %v16_v35 = vld [vmem:[%s762_s0 + $0x8] sm:$0xff] }
   0xb   :  { %v598_v26 = vld [vmem:[%s761_s1 + $0x30] sm:$0xff]   ;;  %v602_v30 = vld [vmem:[%s761_s1 + $0x38] sm:$0xff]   ;;  %v467_v37 = vcombine.low %v16_v35, %v16_v35  ;;  %v468_v38 = vcombine.high %v16_v35, %v16_v35  ;;  %v609_v39 = vld [vmem:[%s761_s1 + $0x100] sm:$0xff]  }
   0xc   :  { %514 = vmatpush3.bf16.msra.mxu0 %v582_v10  ;;  %v599_v27 = vld [vmem:[%s761_s1 + $0xb0] sm:$0xff]   ;;  %v603_v31 = vld [vmem:[%s761_s1 + $0xb8] sm:$0xff]   ;;  %359 = vmatprep.mubr.bf16.mxu0 %v466_v34  ;;  %v610_v40 = vld [vmem:[%s761_s1 + $0x108] sm:$0xff]  }
   0xd   :  { %536 = vmatpush3.bf16.msra.mxu1 %v583_v11  ;;  %515 = vmatprep.subr.bf16.mxu0 %v584_v12  ;;  %v611_v41 = vld [vmem:[%s761_s1 + $0x110] sm:$0xff]   ;;  %v612_v42 = vld [vmem:[%s761_s1 + $0x118] sm:$0xff]   ;;  %v507_v56 = vld [vmem:[%s763_s2] ss:$0 sm:$0xff] }
   0xe   :  { %537 = vmatprep.subr.bf16.mxu1 %v585_v13  ;;  %399 = vmatprep.mubr.bf16.mxu1 %v468_v38  ;;  %v606_v43 = vld [vmem:[%s762_s0 + $0x10] ss:$0 sps:$4 sm:$0xff]   ;;  %v508_v59 = vld [vmem:[%s763_s2 + $0x1] ss:$0 sm:$0xff] }
  0x10   :  { %516 = vmatpush3.bf16.msra.mxu0 %v586_v14 }
  0x11   :  { %538 = vmatpush3.bf16.msra.mxu1 %v587_v15  ;;  %517 = vmatprep.subr.bf16.mxu0 %v588_v16 }
  0x12   :  { %539 = vmatprep.subr.bf16.mxu1 %v589_v17 }
  0x14   :  { %518 = vmatpush3.bf16.msra.mxu0 %v590_v18 }
  0x15   :  { %540 = vmatpush3.bf16.msra.mxu1 %v591_v19  ;;  %519 = vmatprep.subr.bf16.mxu0 %v592_v20 }
  0x16   :  { %541 = vmatprep.subr.bf16.mxu1 %v593_v21 }
  0x18   :  { %520 = vmatpush3.bf16.msra.mxu0 %v594_v22 }
  0x19   :  { %542 = vmatpush3.bf16.msra.mxu1 %v595_v23  ;;  %521 = vmatprep.subr.bf16.mxu0 %v596_v24 }
  0x1a   :  { %543 = vmatprep.subr.bf16.mxu1 %v597_v25 }
  0x1c   :  { %522 = vmatpush3.bf16.msra.mxu0 %v598_v26 }
  0x1d   :  { %544 = vmatpush3.bf16.msra.mxu1 %v599_v27  ;;  %523 = vmatprep.subr.bf16.mxu0 %v600_v28 }
  0x1e   :  { %545 = vmatprep.subr.bf16.mxu1 %v601_v29 }
  0x20   :  { %524 = vmatpush3.bf16.msra.mxu0 %v602_v30 }
  0x21   :  { %546 = vmatpush3.bf16.msra.mxu1 %v603_v31  ;;  %558 = vmatprep.subr.bf16.mxu0 %v613_v36 }
  0x23   :  { %360 = vmatmul.mubr.bf16.vlgmr.msra.gmra.mrb[0].mxu0 %v465_v33 }
  0x24   :  { %400 = vmatmul.mubr.bf16.vlgmr.msra.gmra.mrb[0].mxu1 %v467_v37  ;;  %559 = vmatpush3.bf16.msra.mxu0 %v609_v39 }
  0x25   :  { %560 = vmatprep.subr.bf16.mxu0 %v613_v36  ;;  %566 = vmatprep.mubr.msk.bf16.mxu0 %vm614_vm0, %v613_v36 }
  0x28   :  { %561 = vmatpush3.bf16.msra.mxu0 %v610_v40 }
  0x29   :  { %562 = vmatprep.subr.bf16.mxu0 %v613_v36 }
  0x2c   :  { %563 = vmatpush3.bf16.msra.mxu0 %v611_v41 }
  0x2d   :  { %564 = vmatprep.subr.bf16.mxu0 %v613_v36 }
  0x30   :  { %565 = vmatpush3.bf16.msra.mxu0 %v612_v42 }
  0x33   :  { %567 = vmatmul.mubr.msk.bf16.vlgmr.msra.gmra.mrb[4].mxu0 %vm323_vm1, %v606_v43 }
  0xf6   :  { %v525_v44 = vpop.f32.mrb[0].mxu0 }
  0xf7   :  { %v547_v45 = vpop.f32.mrb[0].mxu1  ;;  %v526_v46 = vpop.f32.mrb[1].mxu0 }
  0xf8   :  { %v527_v47 = vadd.f32 %v526_v46, %v525_v44  ;;  %v548_v48 = vpop.f32.mrb[1].mxu1  ;;  %v528_v49 = vpop.f32.mrb[2].mxu0 }
  0xf9   :  { %v549_v50 = vadd.f32 %v548_v48, %v547_v45  ;;  %v529_v51 = vpop.f32.mrb[3].mxu0  ;;  %v550_v52 = vpop.f32.mrb[2].mxu1 }
  0xfa   :  { %v551_v53 = vpop.f32.mrb[3].mxu1 }
  0xfb   :  { %v402_v54 = vadd.f32 %v549_v50, %v527_v47 }
 0x106   :  { %v441_v55 = vpop.f32.mrb[4].mxu0 }
 0x107   :  { %v442_v57 = vadd.f32 %v441_v55, %v402_v54  ;;  %v568_v58 = vpop.f32.mrb[5].mxu0 }
 0x108   :  { %v444_v60 = vpop.f32.mrb[6].mxu0 }
 0x109   :  { %v452_v61 = vmul.f32 %v507_v56, %v442_v57  ;;  %v569_v62 = vpop.f32.mrb[7].mxu0 }
 0x10b   :  { %v458_v63 = vadd.f32 %v508_v59, %v452_v61 }
 0x10d   :  { %460 = vst.msk [vmem:[%s764_s3] sm:$0xff] %vm459_vm2, %v458_v63 }

</bundles_post_ra>
